<compile_context>
chip_gen: v6e
topology: v6e:2x2x1
jax: 0.10.0
libtpu: 0.0.40
codegen_flags: <defaults>
</compile_context>

<pallas_src>
import math
import functools

import jax
import jax.numpy as jnp
from jax import lax
from jax.experimental import pallas as pl
from jax.experimental.pallas import tpu as pltpu


_SQRT_HALF = 0.7071067811865476


def _layer_norm(x, gamma, beta, eps):
    mean = jnp.mean(x, axis=-1, keepdims=True)
    c = x - mean
    var = jnp.mean(c * c, axis=-1, keepdims=True)
    return c * lax.rsqrt(var + eps) * gamma + beta


def _erf_approx(x):
    # Abramowitz & Stegun 7.1.26, |error| <= 1.5e-7: matches erf-GELU to f32 precision
    # using only exp/mul/add (guaranteed Mosaic lowerings).
    # TODO(synk): switch to jax.nn.gelu(x, approximate=False) once lax.erf lowering in
    # Mosaic is confirmed on all target generations.
    p = 0.3275911
    a1, a2, a3, a4, a5 = 0.254829592, -0.284496736, 1.421413741, -1.453152027, 1.061405429
    z = jnp.abs(x)
    t = 1.0 / (1.0 + p * z)
    poly = ((((a5 * t + a4) * t + a3) * t + a2) * t + a1) * t
    e = 1.0 - poly * jnp.exp(-(z * z))
    return jnp.where(x < 0, -e, e)


def _gelu_exact(x):
    return 0.5 * x * (1.0 + _erf_approx(x * _SQRT_HALF))


def _encode_block_kernel(x_ref, wqkv_ref, bqkv_ref, wproj_ref, wfc1_ref, wfc2_ref,
                         vec_ref, o_ref, *, n_head, eps):
    x = x_ref[...].astype(jnp.float32)            # (tb, L, E)
    tb, L, E = x.shape
    hd = E // n_head
    mm = wqkv_ref.dtype                           # MXU operand dtype (f32 or bf16)

    vecs = vec_ref[...].astype(jnp.float32)       # (7, E)
    b_proj, g1, be1, b_fc1, b_fc2, g2, be2 = (vecs[i:i + 1] for i in range(7))

    x2 = x.reshape(tb * L, E)

    def lin(z, w_ref, b):
        y = jnp.dot(z.astype(mm), w_ref[...], preferred_element_type=jnp.float32)
        return y + b

    # ---- fused QKV projection (single MXU push; Q columns/bias pre-scaled by 1/sqrt(hd)) ----
    qkv = lin(x2, wqkv_ref, bqkv_ref[...].astype(jnp.float32)).reshape(tb, L, 3 * E)

    # ---- multi-head attention: heads stacked along the batch dim -> one batched matmul pair ----
    def split_heads(off):
        parts = [qkv[..., off + h * hd: off + (h + 1) * hd] for h in range(n_head)]
        return parts[0] if n_head == 1 else jnp.concatenate(parts, axis=0)   # (H*tb, L, hd)

    qh = split_heads(0)
    kh = split_heads(E)
    vh = split_heads(2 * E)

    s = jnp.einsum('gld,gmd->glm', qh.astype(mm), kh.astype(mm),
                   preferred_element_type=jnp.float32)                       # (H*tb, L, L)
    s = s - jnp.max(s, axis=-1, keepdims=True)
    p = jnp.exp(s)
    p = p / jnp.sum(p, axis=-1, keepdims=True)      # exact normalization (matches F.softmax)
    y = jnp.einsum('glm,gmd->gld', p.astype(mm), vh.astype(mm),
                   preferred_element_type=jnp.float32)                       # (H*tb, L, hd)

    # merge heads back into the embedding lanes: (H*tb, L, hd) -> (tb, L, E)
    if n_head > 1:
        y = jnp.concatenate([y[h * tb:(h + 1) * tb] for h in range(n_head)], axis=-1)
    y2 = y.reshape(tb * L, E)

    # ---- attention output projection, residual, LayerNorm1 ----
    x1 = _layer_norm(x2 + lin(y2, wproj_ref, b_proj), g1, be1, eps)

    # ---- MLP: Linear -> GELU(erf) -> Linear, residual, LayerNorm2 ----
    h1 = _gelu_exact(lin(x1, wfc1_ref, b_fc1))
    out = _layer_norm(x1 + lin(h1, wfc2_ref, b_fc2), g2, be2, eps)

    o_ref[...] = out.reshape(tb, L, E).astype(o_ref.dtype)


def _pick_batch_tile(B, L, E, n_head, requested=None, vmem_budget_bytes=None):
    if requested is not None:
        tb = max(1, min(B, requested))
    else:
        if vmem_budget_bytes is None:
            # conservative: fits comfortably under scoped-VMEM defaults on v5e/v6e/v7x
            # while leaving room for double-buffered x/out tiles + resident weights.
            vmem_budget_bytes = 8 * 1024 * 1024
        # per batch row (f32): x, qkv(3E), attn y, x1, h1, h2, out (~12E) + per-head scores
        bytes_per_batch = L * (12 * E + n_head * L) * 4
        cap = max(1, vmem_budget_bytes // max(1, bytes_per_batch))
        target = max(1, -(-256 // L))          # aim for >= 256 matmul rows per tile
        tb = max(1, min(B, cap, target))
    # keep >= 2 grid steps where possible (v7x has 2 TensorCores; grid axis is "parallel")
    if tb >= B and B > 1:
        tb = max(1, B // 2)
    while B % tb:
        tb -= 1
    return tb


def _const_spec(shape):
    zeros = (0,) * len(shape)
    return pl.BlockSpec(shape, lambda i, _z=zeros: _z)   # constant block -> VMEM resident


def prepare_encode_block_params(params, n_head, mxu_dtype=None):
    """One-time parameter prep (hoisted out of the per-call path): transpose to z@W
    layout, fuse QKV (folding 1/sqrt(head_dim) into the Q part), pack small vectors."""
    E = params["q_w"].shape[0]
    hd = E // n_head
    scale = 1.0 / math.sqrt(hd)

    def w(name):
        return jnp.asarray(params[name], jnp.float32).T

    def v(name):
        return jnp.asarray(params[name], jnp.float32).reshape(-1)

    w_qkv = jnp.concatenate([w("q_w") * scale, w("k_w"), w("v_w")], axis=1)     # (E, 3E)
    b_qkv = jnp.concatenate([v("q_b") * scale, v("k_b"), v("v_b")]).reshape(1, 3 * E)
    w_proj, w_fc1, w_fc2 = w("proj_w"), w("fc1_w"), w("fc2_w")
    vecs = jnp.stack([v(k) for k in
                      ("proj_b", "ln1_g", "ln1_b", "fc1_b", "fc2_b", "ln2_g", "ln2_b")],
                     axis=0)                                                     # (7, E)
    if mxu_dtype is not None:   # e.g. jnp.bfloat16 on v6e/v7x: MXU operands only
        w_qkv, w_proj, w_fc1, w_fc2 = (a.astype(mxu_dtype)
                                       for a in (w_qkv, w_proj, w_fc1, w_fc2))
    return dict(w_qkv=w_qkv, b_qkv=b_qkv, w_proj=w_proj, w_fc1=w_fc1, w_fc2=w_fc2,
                vecs=vecs)


def encode_block(x, prepped, n_head, *, batch_tile=None, eps=1e-5, vmem_budget_bytes=None):
    """EncodeBlock forward. x: (B, L, E). `prepped` from prepare_encode_block_params."""
    B, L, E = x.shape
    assert E % n_head == 0
    tb = _pick_batch_tile(B, L, E, n_head, batch_tile, vmem_budget_bytes)

    args = (x, prepped["w_qkv"], prepped["b_qkv"], prepped["w_proj"],
            prepped["w_fc1"], prepped["w_fc2"], prepped["vecs"])

    in_specs = [pl.BlockSpec((tb, L, E), lambda i: (i, 0, 0))]
    in_specs += [_const_spec(a.shape) for a in args[1:]]

    return pl.pallas_call(
        functools.partial(_encode_block_kernel, n_head=n_head, eps=eps),
        out_shape=jax.ShapeDtypeStruct((B, L, E), x.dtype),
        grid=(B // tb,),
        in_specs=in_specs,
        out_specs=pl.BlockSpec((tb, L, E), lambda i: (i, 0, 0)),
        compiler_params=pltpu.CompilerParams(
            dimension_semantics=("parallel",),
            vmem_limit_bytes=32 * 1024 * 1024),
    )(*args)


if __name__ == "__main__":
    n_embd, n_head, n_agent, batch = 32, 2, 8, 8   # E, H, L (=n_agent), B
    E = n_embd
    std = 0.02
    key = jax.random.PRNGKey(0)
    ks = jax.random.split(key, 8)

    params = dict(
        q_w=std * jax.random.normal(ks[0], (E, E), jnp.float32),
        q_b=jnp.zeros((E,), jnp.float32),
        k_w=std * jax.random.normal(ks[1], (E, E), jnp.float32),
        k_b=jnp.zeros((E,), jnp.float32),
        v_w=std * jax.random.normal(ks[2], (E, E), jnp.float32),
        v_b=jnp.zeros((E,), jnp.float32),
        proj_w=std * jax.random.normal(ks[3], (E, E), jnp.float32),
        proj_b=jnp.zeros((E,), jnp.float32),
        fc1_w=std * jax.random.normal(ks[4], (E, E), jnp.float32),   # mlp hidden = 1 * n_embd
        fc1_b=jnp.zeros((E,), jnp.float32),
        fc2_w=std * jax.random.normal(ks[5], (E, E), jnp.float32),
        fc2_b=jnp.zeros((E,), jnp.float32),
        ln1_g=jnp.ones((E,), jnp.float32),
        ln1_b=jnp.zeros((E,), jnp.float32),
        ln2_g=jnp.ones((E,), jnp.float32),
        ln2_b=jnp.zeros((E,), jnp.float32),
    )

    x = jax.random.normal(ks[6], (batch, n_agent, E), jnp.float32)   # (B, L, E), batch-first

    prepped = prepare_encode_block_params(params, n_head)            # done once (hoisted)
    out = encode_block(x, prepped, n_head)
    jax.block_until_ready(out)
    assert out.shape == (batch, n_agent, E)
    print("KERNEL_OK")
</pallas_src>

<mosaic_0001>
module attributes {stable_mosaic.version = 11 : i64} {
  func.func @_encode_block_kernel(%arg0: i32, %arg1: memref<4x8x32xf32, #tpu.memory_space<vmem>>, %arg2: memref<32x96xf32, #tpu.memory_space<vmem>>, %arg3: memref<1x96xf32, #tpu.memory_space<vmem>>, %arg4: memref<32x32xf32, #tpu.memory_space<vmem>>, %arg5: memref<32x32xf32, #tpu.memory_space<vmem>>, %arg6: memref<32x32xf32, #tpu.memory_space<vmem>>, %arg7: memref<7x32xf32, #tpu.memory_space<vmem>>, %arg8: memref<4x8x32xf32, #tpu.memory_space<vmem>>) attributes {dimension_semantics = [#tpu.dimension_semantics<parallel>], iteration_bounds = array<i64: 2>, scalar_prefetch = 0 : i64, scratch_operands = 0 : i64, tpu.core_type = #tpu.core_type<tc>, window_params = [{transform_indices = @transform_0, window_bounds = array<i64: 4, 8, 32>}, {pipeline_mode = #tpu.pipeline_mode<synchronous>, transform_indices = @transform_1, window_bounds = array<i64: 32, 96>}, {pipeline_mode = #tpu.pipeline_mode<synchronous>, transform_indices = @transform_2, window_bounds = array<i64: 1, 96>}, {pipeline_mode = #tpu.pipeline_mode<synchronous>, transform_indices = @transform_3, window_bounds = array<i64: 32, 32>}, {pipeline_mode = #tpu.pipeline_mode<synchronous>, transform_indices = @transform_4, window_bounds = array<i64: 32, 32>}, {pipeline_mode = #tpu.pipeline_mode<synchronous>, transform_indices = @transform_5, window_bounds = array<i64: 32, 32>}, {pipeline_mode = #tpu.pipeline_mode<synchronous>, transform_indices = @transform_6, window_bounds = array<i64: 7, 32>}, {transform_indices = @transform_7, window_bounds = array<i64: 4, 8, 32>}]} {
    %c0 = arith.constant 0 : index
    %c0_0 = arith.constant 0 : index
    %c0_1 = arith.constant 0 : index
    %0 = vector.load %arg1[%c0, %c0_0, %c0_1] : memref<4x8x32xf32, #tpu.memory_space<vmem>>, vector<4x8x32xf32>
    %c0_2 = arith.constant 0 : index
    %c0_3 = arith.constant 0 : index
    %1 = vector.load %arg7[%c0_2, %c0_3] : memref<7x32xf32, #tpu.memory_space<vmem>>, vector<7x32xf32>
    %2 = vector.extract_strided_slice %1 {offsets = [0, 0], sizes = [1, 32], strides = [1, 1]} : vector<7x32xf32> to vector<1x32xf32>
    %3 = vector.extract_strided_slice %1 {offsets = [1, 0], sizes = [1, 32], strides = [1, 1]} : vector<7x32xf32> to vector<1x32xf32>
    %4 = vector.extract_strided_slice %1 {offsets = [2, 0], sizes = [1, 32], strides = [1, 1]} : vector<7x32xf32> to vector<1x32xf32>
    %5 = vector.extract_strided_slice %1 {offsets = [3, 0], sizes = [1, 32], strides = [1, 1]} : vector<7x32xf32> to vector<1x32xf32>
    %6 = vector.extract_strided_slice %1 {offsets = [4, 0], sizes = [1, 32], strides = [1, 1]} : vector<7x32xf32> to vector<1x32xf32>
    %7 = vector.extract_strided_slice %1 {offsets = [5, 0], sizes = [1, 32], strides = [1, 1]} : vector<7x32xf32> to vector<1x32xf32>
    %8 = vector.extract_strided_slice %1 {offsets = [6, 0], sizes = [1, 32], strides = [1, 1]} : vector<7x32xf32> to vector<1x32xf32>
    %9 = vector.shape_cast %0 : vector<4x8x32xf32> to vector<32x32xf32>
    %c0_4 = arith.constant 0 : index
    %c0_5 = arith.constant 0 : index
    %10 = vector.load %arg3[%c0_4, %c0_5] : memref<1x96xf32, #tpu.memory_space<vmem>>, vector<1x96xf32>
    %c0_6 = arith.constant 0 : index
    %c0_7 = arith.constant 0 : index
    %11 = vector.load %arg2[%c0_6, %c0_7] : memref<32x96xf32, #tpu.memory_space<vmem>>, vector<32x96xf32>
    %cst = arith.constant dense<0.000000e+00> : vector<32x96xf32>
    %12 = tpu.matmul %9, %11, %cst {dimension_numbers = #tpu.dot_dimension_numbers<[1], [0], [0], [1], [0, 0, 1, 1], [], []>} : vector<32x32xf32>, vector<32x96xf32>, vector<32x96xf32> -> vector<32x96xf32>
    %13 = vector.broadcast %10 : vector<1x96xf32> to vector<32x96xf32>
    %14 = arith.addf %12, %13 : vector<32x96xf32>
    %15 = vector.shape_cast %14 : vector<32x96xf32> to vector<4x8x96xf32>
    %16 = vector.extract_strided_slice %15 {offsets = [0, 0, 0], sizes = [4, 8, 16], strides = [1, 1, 1]} : vector<4x8x96xf32> to vector<4x8x16xf32>
    %17 = vector.extract_strided_slice %15 {offsets = [0, 0, 16], sizes = [4, 8, 16], strides = [1, 1, 1]} : vector<4x8x96xf32> to vector<4x8x16xf32>
    %18 = tpu.concatenate %16, %17 in 0 : vector<4x8x16xf32>, vector<4x8x16xf32> -> vector<8x8x16xf32>
    %19 = vector.extract_strided_slice %15 {offsets = [0, 0, 32], sizes = [4, 8, 16], strides = [1, 1, 1]} : vector<4x8x96xf32> to vector<4x8x16xf32>
    %20 = vector.extract_strided_slice %15 {offsets = [0, 0, 48], sizes = [4, 8, 16], strides = [1, 1, 1]} : vector<4x8x96xf32> to vector<4x8x16xf32>
    %21 = tpu.concatenate %19, %20 in 0 : vector<4x8x16xf32>, vector<4x8x16xf32> -> vector<8x8x16xf32>
    %22 = vector.extract_strided_slice %15 {offsets = [0, 0, 64], sizes = [4, 8, 16], strides = [1, 1, 1]} : vector<4x8x96xf32> to vector<4x8x16xf32>
    %23 = vector.extract_strided_slice %15 {offsets = [0, 0, 80], sizes = [4, 8, 16], strides = [1, 1, 1]} : vector<4x8x96xf32> to vector<4x8x16xf32>
    %24 = tpu.concatenate %22, %23 in 0 : vector<4x8x16xf32>, vector<4x8x16xf32> -> vector<8x8x16xf32>
    "tpu.trace_start"() <{level = 10 : i32, message = "gld,gmd->glm"}> : () -> ()
    %cst_8 = arith.constant dense<0.000000e+00> : vector<8x8x8xf32>
    %25 = tpu.matmul %18, %21, %cst_8 {dimension_numbers = #tpu.dot_dimension_numbers<[2], [2], [1], [1], [0, 0, 0, 1, 1, 1], [0], [0]>} : vector<8x8x16xf32>, vector<8x8x16xf32>, vector<8x8x8xf32> -> vector<8x8x8xf32>
    "tpu.trace_stop"() : () -> ()
    %cst_9 = arith.constant dense<0xFF800000> : vector<8x8xf32>
    %26 = vector.multi_reduction <maximumf>, %25, %cst_9 [2] : vector<8x8x8xf32> to vector<8x8xf32>
    %27 = vector.shape_cast %26 : vector<8x8xf32> to vector<8x8x1xf32>
    %28 = vector.broadcast %27 : vector<8x8x1xf32> to vector<8x8x8xf32>
    %29 = arith.subf %25, %28 : vector<8x8x8xf32>
    %30 = math.exp %29 : vector<8x8x8xf32>
    %cst_10 = arith.constant dense<0.000000e+00> : vector<8x8xf32>
    %31 = vector.multi_reduction <add>, %30, %cst_10 [2] : vector<8x8x8xf32> to vector<8x8xf32>
    %32 = vector.shape_cast %31 : vector<8x8xf32> to vector<8x8x1xf32>
    %33 = vector.broadcast %32 : vector<8x8x1xf32> to vector<8x8x8xf32>
    %34 = arith.divf %30, %33 : vector<8x8x8xf32>
    "tpu.trace_start"() <{level = 10 : i32, message = "glm,gmd->gld"}> : () -> ()
    %cst_11 = arith.constant dense<0.000000e+00> : vector<8x8x16xf32>
    %35 = tpu.matmul %34, %24, %cst_11 {dimension_numbers = #tpu.dot_dimension_numbers<[2], [1], [1], [2], [0, 0, 0, 1, 1, 2], [0], [0]>} : vector<8x8x8xf32>, vector<8x8x16xf32>, vector<8x8x16xf32> -> vector<8x8x16xf32>
    "tpu.trace_stop"() : () -> ()
    %36 = vector.extract_strided_slice %35 {offsets = [0, 0, 0], sizes = [4, 8, 16], strides = [1, 1, 1]} : vector<8x8x16xf32> to vector<4x8x16xf32>
    %37 = vector.extract_strided_slice %35 {offsets = [4, 0, 0], sizes = [4, 8, 16], strides = [1, 1, 1]} : vector<8x8x16xf32> to vector<4x8x16xf32>
    %38 = tpu.concatenate %36, %37 in 2 : vector<4x8x16xf32>, vector<4x8x16xf32> -> vector<4x8x32xf32>
    %39 = vector.shape_cast %38 : vector<4x8x32xf32> to vector<32x32xf32>
    %c0_12 = arith.constant 0 : index
    %c0_13 = arith.constant 0 : index
    %40 = vector.load %arg4[%c0_12, %c0_13] : memref<32x32xf32, #tpu.memory_space<vmem>>, vector<32x32xf32>
    %cst_14 = arith.constant dense<0.000000e+00> : vector<32x32xf32>
    %41 = tpu.matmul %39, %40, %cst_14 {dimension_numbers = #tpu.dot_dimension_numbers<[1], [0], [0], [1], [0, 0, 1, 1], [], []>} : vector<32x32xf32>, vector<32x32xf32>, vector<32x32xf32> -> vector<32x32xf32>
    %42 = vector.broadcast %2 : vector<1x32xf32> to vector<32x32xf32>
    %43 = arith.addf %41, %42 : vector<32x32xf32>
    %44 = arith.addf %9, %43 : vector<32x32xf32>
    %cst_15 = arith.constant dense<0.000000e+00> : vector<32xf32>
    %45 = vector.multi_reduction <add>, %44, %cst_15 [1] : vector<32x32xf32> to vector<32xf32>
    %46 = vector.shape_cast %45 : vector<32xf32> to vector<32x1xf32>
    %cst_16 = arith.constant 3.200000e+01 : f32
    %47 = vector.broadcast %cst_16 : f32 to vector<32x1xf32>
    %48 = arith.divf %46, %47 : vector<32x1xf32>
    %49 = vector.broadcast %48 : vector<32x1xf32> to vector<32x32xf32>
    %50 = arith.subf %44, %49 : vector<32x32xf32>
    %51 = arith.mulf %50, %50 : vector<32x32xf32>
    %cst_17 = arith.constant dense<0.000000e+00> : vector<32xf32>
    %52 = vector.multi_reduction <add>, %51, %cst_17 [1] : vector<32x32xf32> to vector<32xf32>
    %53 = vector.shape_cast %52 : vector<32xf32> to vector<32x1xf32>
    %cst_18 = arith.constant 3.200000e+01 : f32
    %54 = vector.broadcast %cst_18 : f32 to vector<32x1xf32>
    %55 = arith.divf %53, %54 : vector<32x1xf32>
    %cst_19 = arith.constant 9.99999974E-6 : f32
    %56 = vector.broadcast %cst_19 : f32 to vector<32x1xf32>
    %57 = arith.addf %55, %56 : vector<32x1xf32>
    %58 = math.rsqrt %57 : vector<32x1xf32>
    %59 = vector.broadcast %58 : vector<32x1xf32> to vector<32x32xf32>
    %60 = arith.mulf %50, %59 : vector<32x32xf32>
    %61 = vector.broadcast %3 : vector<1x32xf32> to vector<32x32xf32>
    %62 = arith.mulf %60, %61 : vector<32x32xf32>
    %63 = vector.broadcast %4 : vector<1x32xf32> to vector<32x32xf32>
    %64 = arith.addf %62, %63 : vector<32x32xf32>
    %c0_20 = arith.constant 0 : index
    %c0_21 = arith.constant 0 : index
    %65 = vector.load %arg5[%c0_20, %c0_21] : memref<32x32xf32, #tpu.memory_space<vmem>>, vector<32x32xf32>
    %cst_22 = arith.constant dense<0.000000e+00> : vector<32x32xf32>
    %66 = tpu.matmul %64, %65, %cst_22 {dimension_numbers = #tpu.dot_dimension_numbers<[1], [0], [0], [1], [0, 0, 1, 1], [], []>} : vector<32x32xf32>, vector<32x32xf32>, vector<32x32xf32> -> vector<32x32xf32>
    %67 = vector.broadcast %5 : vector<1x32xf32> to vector<32x32xf32>
    %68 = arith.addf %66, %67 : vector<32x32xf32>
    %cst_23 = arith.constant 5.000000e-01 : f32
    %69 = vector.broadcast %cst_23 : f32 to vector<32x32xf32>
    %70 = arith.mulf %69, %68 : vector<32x32xf32>
    %cst_24 = arith.constant 0.707106769 : f32
    %71 = vector.broadcast %cst_24 : f32 to vector<32x32xf32>
    %72 = arith.mulf %68, %71 : vector<32x32xf32>
    %73 = math.absf %72 : vector<32x32xf32>
    %cst_25 = arith.constant 0.327591091 : f32
    %74 = vector.broadcast %cst_25 : f32 to vector<32x32xf32>
    %75 = arith.mulf %74, %73 : vector<32x32xf32>
    %cst_26 = arith.constant 1.000000e+00 : f32
    %76 = vector.broadcast %cst_26 : f32 to vector<32x32xf32>
    %77 = arith.addf %76, %75 : vector<32x32xf32>
    %cst_27 = arith.constant 1.000000e+00 : f32
    %78 = vector.broadcast %cst_27 : f32 to vector<32x32xf32>
    %79 = arith.divf %78, %77 : vector<32x32xf32>
    %cst_28 = arith.constant 1.06140542 : f32
    %80 = vector.broadcast %cst_28 : f32 to vector<32x32xf32>
    %81 = arith.mulf %80, %79 : vector<32x32xf32>
    %cst_29 = arith.constant -1.45315206 : f32
    %82 = vector.broadcast %cst_29 : f32 to vector<32x32xf32>
    %83 = arith.addf %81, %82 : vector<32x32xf32>
    %84 = arith.mulf %83, %79 : vector<32x32xf32>
    %cst_30 = arith.constant 1.42141378 : f32
    %85 = vector.broadcast %cst_30 : f32 to vector<32x32xf32>
    %86 = arith.addf %84, %85 : vector<32x32xf32>
    %87 = arith.mulf %86, %79 : vector<32x32xf32>
    %cst_31 = arith.constant -0.284496725 : f32
    %88 = vector.broadcast %cst_31 : f32 to vector<32x32xf32>
    %89 = arith.addf %87, %88 : vector<32x32xf32>
    %90 = arith.mulf %89, %79 : vector<32x32xf32>
    %cst_32 = arith.constant 0.254829586 : f32
    %91 = vector.broadcast %cst_32 : f32 to vector<32x32xf32>
    %92 = arith.addf %90, %91 : vector<32x32xf32>
    %93 = arith.mulf %92, %79 : vector<32x32xf32>
    %94 = arith.mulf %73, %73 : vector<32x32xf32>
    %cst_33 = arith.constant 0.000000e+00 : f32
    %95 = vector.broadcast %cst_33 : f32 to vector<32x32xf32>
    %96 = arith.subf %95, %94 : vector<32x32xf32>
    %97 = math.exp %96 : vector<32x32xf32>
    %98 = arith.mulf %93, %97 : vector<32x32xf32>
    %cst_34 = arith.constant 1.000000e+00 : f32
    %99 = vector.broadcast %cst_34 : f32 to vector<32x32xf32>
    %100 = arith.subf %99, %98 : vector<32x32xf32>
    %cst_35 = arith.constant 0.000000e+00 : f32
    %101 = vector.broadcast %cst_35 : f32 to vector<32x32xf32>
    %102 = arith.cmpf olt, %72, %101 : vector<32x32xf32>
    %cst_36 = arith.constant 0.000000e+00 : f32
    %103 = vector.broadcast %cst_36 : f32 to vector<32x32xf32>
    %104 = arith.subf %103, %100 : vector<32x32xf32>
    %105 = arith.select %102, %104, %100 : vector<32x32xi1>, vector<32x32xf32>
    %cst_37 = arith.constant 1.000000e+00 : f32
    %106 = vector.broadcast %cst_37 : f32 to vector<32x32xf32>
    %107 = arith.addf %106, %105 : vector<32x32xf32>
    %108 = arith.mulf %70, %107 : vector<32x32xf32>
    %c0_38 = arith.constant 0 : index
    %c0_39 = arith.constant 0 : index
    %109 = vector.load %arg6[%c0_38, %c0_39] : memref<32x32xf32, #tpu.memory_space<vmem>>, vector<32x32xf32>
    %cst_40 = arith.constant dense<0.000000e+00> : vector<32x32xf32>
    %110 = tpu.matmul %108, %109, %cst_40 {dimension_numbers = #tpu.dot_dimension_numbers<[1], [0], [0], [1], [0, 0, 1, 1], [], []>} : vector<32x32xf32>, vector<32x32xf32>, vector<32x32xf32> -> vector<32x32xf32>
    %111 = vector.broadcast %6 : vector<1x32xf32> to vector<32x32xf32>
    %112 = arith.addf %110, %111 : vector<32x32xf32>
    %113 = arith.addf %64, %112 : vector<32x32xf32>
    %cst_41 = arith.constant dense<0.000000e+00> : vector<32xf32>
    %114 = vector.multi_reduction <add>, %113, %cst_41 [1] : vector<32x32xf32> to vector<32xf32>
    %115 = vector.shape_cast %114 : vector<32xf32> to vector<32x1xf32>
    %cst_42 = arith.constant 3.200000e+01 : f32
    %116 = vector.broadcast %cst_42 : f32 to vector<32x1xf32>
    %117 = arith.divf %115, %116 : vector<32x1xf32>
    %118 = vector.broadcast %117 : vector<32x1xf32> to vector<32x32xf32>
    %119 = arith.subf %113, %118 : vector<32x32xf32>
    %120 = arith.mulf %119, %119 : vector<32x32xf32>
    %cst_43 = arith.constant dense<0.000000e+00> : vector<32xf32>
    %121 = vector.multi_reduction <add>, %120, %cst_43 [1] : vector<32x32xf32> to vector<32xf32>
    %122 = vector.shape_cast %121 : vector<32xf32> to vector<32x1xf32>
    %cst_44 = arith.constant 3.200000e+01 : f32
    %123 = vector.broadcast %cst_44 : f32 to vector<32x1xf32>
    %124 = arith.divf %122, %123 : vector<32x1xf32>
    %cst_45 = arith.constant 9.99999974E-6 : f32
    %125 = vector.broadcast %cst_45 : f32 to vector<32x1xf32>
    %126 = arith.addf %124, %125 : vector<32x1xf32>
    %127 = math.rsqrt %126 : vector<32x1xf32>
    %128 = vector.broadcast %127 : vector<32x1xf32> to vector<32x32xf32>
    %129 = arith.mulf %119, %128 : vector<32x32xf32>
    %130 = vector.broadcast %7 : vector<1x32xf32> to vector<32x32xf32>
    %131 = arith.mulf %129, %130 : vector<32x32xf32>
    %132 = vector.broadcast %8 : vector<1x32xf32> to vector<32x32xf32>
    %133 = arith.addf %131, %132 : vector<32x32xf32>
    %134 = vector.shape_cast %133 : vector<32x32xf32> to vector<4x8x32xf32>
    %c0_46 = arith.constant 0 : index
    %c0_47 = arith.constant 0 : index
    %c0_48 = arith.constant 0 : index
    %135 = vector.load %arg8[%c0_46, %c0_47, %c0_48] : memref<4x8x32xf32, #tpu.memory_space<vmem>>, vector<4x8x32xf32>
    tpu.vector_store %arg8[%c0_46, %c0_47, %c0_48], %134 {strides = array<i32>} : memref<4x8x32xf32, #tpu.memory_space<vmem>>, vector<4x8x32xf32>,
    return
  }
  func.func @transform_0(%arg0: i32) -> (i32, i32, i32) {
    %c0_i32 = arith.constant 0 : i32
    %c0_i32_0 = arith.constant 0 : i32
    %c0_i32_1 = arith.constant 0 : i32
    return %arg0, %c0_i32, %c0_i32_0 : i32, i32, i32
  }
  func.func @transform_1(%arg0: i32) -> (i32, i32) {
    %c0_i32 = arith.constant 0 : i32
    %c0_i32_0 = arith.constant 0 : i32
    %c0_i32_1 = arith.constant 0 : i32
    return %c0_i32, %c0_i32_0 : i32, i32
  }
  func.func @transform_2(%arg0: i32) -> (i32, i32) {
    %c0_i32 = arith.constant 0 : i32
    %c0_i32_0 = arith.constant 0 : i32
    %c0_i32_1 = arith.constant 0 : i32
    return %c0_i32, %c0_i32_0 : i32, i32
  }
  func.func @transform_3(%arg0: i32) -> (i32, i32) {
    %c0_i32 = arith.constant 0 : i32
    %c0_i32_0 = arith.constant 0 : i32
    %c0_i32_1 = arith.constant 0 : i32
    return %c0_i32, %c0_i32_0 : i32, i32
  }
  func.func @transform_4(%arg0: i32) -> (i32, i32) {
    %c0_i32 = arith.constant 0 : i32
    %c0_i32_0 = arith.constant 0 : i32
    %c0_i32_1 = arith.constant 0 : i32
    return %c0_i32, %c0_i32_0 : i32, i32
  }
  func.func @transform_5(%arg0: i32) -> (i32, i32) {
    %c0_i32 = arith.constant 0 : i32
    %c0_i32_0 = arith.constant 0 : i32
    %c0_i32_1 = arith.constant 0 : i32
    return %c0_i32, %c0_i32_0 : i32, i32
  }
  func.func @transform_6(%arg0: i32) -> (i32, i32) {
    %c0_i32 = arith.constant 0 : i32
    %c0_i32_0 = arith.constant 0 : i32
    %c0_i32_1 = arith.constant 0 : i32
    return %c0_i32, %c0_i32_0 : i32, i32
  }
  func.func @transform_7(%arg0: i32) -> (i32, i32, i32) {
    %c0_i32 = arith.constant 0 : i32
    %c0_i32_0 = arith.constant 0 : i32
    %c0_i32_1 = arith.constant 0 : i32
    return %arg0, %c0_i32, %c0_i32_0 : i32, i32, i32
  }
}

</mosaic_0001>

<bundles_post_ra>
// kernel: tpu_custom_call.1
= control target key start
LH: loop header
LB: loop body
LE: loop exit
PB: predicated region body
PF: predicated region fallthrough
CT: control target
= control target key end

     0   :  { %s3709_s0 = inlined_call_operand.hbm [shape: f32[8,8,32], index: 0, kind: input, shape index: {}]   ;;  %s3710_s1 = inlined_call_operand.hbm [shape: f32[32,96], index: 1, kind: input, shape index: {}]   ;;  %s3711_s2 = inlined_call_operand.vmem [shape: f32[1,96], index: 2, kind: input, shape index: {}]   ;;  %s3712_s3 = inlined_call_operand.hbm [shape: f32[32,32], index: 3, kind: input, shape index: {}]   ;;  %s3713_s4 = inlined_call_operand.hbm [shape: f32[32,32], index: 4, kind: input, shape index: {}]   ;;  %s3714_s5 = inlined_call_operand.hbm [shape: f32[32,32], index: 5, kind: input, shape index: {}]   ;;  %s3715_s6 = inlined_call_operand.vmem [shape: f32[7,32], index: 6, kind: input, shape index: {}]   ;;  %s3716_s7 = inlined_call_operand.hbm [shape: f32[8,8,32], index: 7, kind: output, shape index: {}]  }
   0x1   :  { %3723 = sst [smem:[#allocation16_spill]] %s3710_s1 }
   0x2   :  { %12 = vsyncpa [#allocation3], 0 }
   0x3   :  { %14 = vsyncpa [#allocation3 + $0x1], 0 }
   0x4   :  { %15 = vsyncpa [#allocation6], 0 }
   0x5   :  { %16 = vsyncpa [#allocation9], 0 }
   0x6   :  { %17 = vsyncpa [#allocation4], 0 }
   0x7   :  { %19 = vsyncpa [#allocation4 + $0x1], 0  ;;  %s3194_s24 = smov 0   ;;  %s3196_s25 = smov 0  }
   0x8   :  { %s3198_s26 = smov 0   ;;  %s3200_s27 = smov 0  }
   0x9 LB: > { %s3215_s28 = sadd.s32 4294967295, %s3136_s27   ;;  %s2506_s29 = sadd.s32 4294967294, %s3136_s27   ;;  %s3136_s27 = sphi %s3200_s27, %s3745_s27   ;;  %s3132_s26 = sphi %s3198_s26, %s3744_s26   ;;  %s3128_s25 = sphi %s3196_s25, %s3743_s25   ;;  %s3124_s24 = sphi %s3194_s24, %s3742_s24  }
   0xa   : > { %p45_p0 = scmp.ne.s32.totalorder %s3128_s25, %s3124_s24  ;;  %p3717_p1 = scmp.eq.s32.totalorder %s3215_s28, 0 }
   0xb   : > { %p195_p2 = scmp.eq.s32.totalorder %s3215_s28, 1  ;;  %p201_p3 = scmp.eq.s32.totalorder %s2506_s29, 1 }
   0xc   : > { %p3224_p4 = por %p3717_p1, %p45_p0  ;;  %p2507_p5 = scmp.ge.s32.totalorder %s3136_s27, 1 }
   0xd   : > { %p3229_p6 = por %p201_p3, %p45_p0  ;;  %p208_p7 = scmp.lt.s32.totalorder %s3136_s27, 3 }
   0xe   : > { %s3724_s30 = scalar_select %p3224_p4, 1, 0 }
   0xf   : > { %s3725_s8 = scalar_select %p3229_p6, 1, 0 }
  0x10   : > { %p3234_p8 = pnand %p2507_p5, %p208_p7  ;;  %s3138_s10 = smov [#allocation5]  }
  0x11   : > { %s220_s11 = sshll.u32 %s3138_s10, 4  ;;  %s3139_s13 = smov [#allocation8]   ;;  %s221_s11 = int_to_ptr.vmem [resolvable:$true] %s220_s11 }
  0x12   : > { %s3726_s9 = scalar_select %p3234_p8, 1, 0 }
  0x13   : > { %p2791_p9 = pneg %p3234_p8  ;;  %s249_s14 = sshll.u32 %s3139_s13, 4  ;;  %s250_s14 = int_to_ptr.vmem [resolvable:$true] %s249_s14 }
  0x14   : > { %s3140_s15 = smov [#allocation7]   ;;  %s2943_s17 = scalar_lea.vmem %s221_s11, 512 }
  0x15   : > { %p3243_p11 = pnand %p2791_p9, %p3717_p1  ;;  %s236_s16 = sshll.u32 %s3140_s15, 4  ;;  %s237_s16 = int_to_ptr.vmem [resolvable:$true] %s236_s16 }
  0x16   : > { %p2944_p13 = scmp.ne.s32.totalorder %s221_s11, %s2943_s17  ;;  %p2951_p5 = scmp.lt.s32.totalorder %s221_s11, %s221_s11 }
  0x17   : > { %p2934_p12 = pneg %p3243_p11  ;;  %p2952_p7 = scmp.lt.s32.totalorder %s2943_s17, %s2943_s17 }
  0x19   : > { %p2946_p0 = pnand %p2944_p13, %p2934_p12  ;;  %p2953_p9 = por %p2952_p7, %p2951_p5 }
  0x1b   : > { %p2947_p3 = pneg %p2946_p0 }
  0x1d   : > { %p2954_p10 = pnand %p2953_p9, %p2947_p3 }
  0x1f   : > { %2957 = shalt.err (!%p2954_p10)
}
  0x20   : > { %s3718_s18 = smov 128   ;;  %s3719_s19 = smov 8  }
  0x21   : > { %s3728_s1 = sld [smem:[#allocation16_spill]]  ;;  %s2969_s22 = scalar_lea.vmem %s250_s14, 512 }
  0x22   : > { %p2970_p13 = scmp.ne.s32.totalorder %s250_s14, %s2969_s22  ;;  %p2977_p3 = scmp.lt.s32.totalorder %s250_s14, %s250_s14 }
  0x23   : > { %p2978_p10 = scmp.lt.s32.totalorder %s2969_s22, %s2969_s22 }
  0x24   : > { %p2972_p0 = pnand %p2970_p13, %p2934_p12 }
  0x25   : > { %p2979_p7 = por %p2978_p10, %p2977_p3 }
  0x26   : > { %p2973_p5 = pneg %p2972_p0 }
  0x27   : > { %2794 = dma.hbm_to_vmem [thread:$0]  (!%p3243_p11), %s3728_s1, 512, %s221_s11, [#allocation6], %s3718_s18, %s3718_s18, %s3719_s19  }
  0x28   : > { %p2980_p9 = pnand %p2979_p7, %p2973_p5 }
  0x2a   : > { %2983 = shalt.err (!%p2980_p9)
}
  0x2b   : > { %2800 = dma.hbm_to_vmem [thread:$0]  (!%p3243_p11), %s3713_s4, 512, %s250_s14, [#allocation9], %s3718_s18, %s3718_s18, %s3719_s19  }
  0x2c   : > { %s2995_s10 = scalar_lea.vmem %s237_s16, 512  ;;  %p3003_p3 = scmp.lt.s32.totalorder %s237_s16, %s237_s16 }
  0x2d   : > { %p2996_p1 = scmp.ne.s32.totalorder %s237_s16, %s2995_s10  ;;  %p3004_p5 = scmp.lt.s32.totalorder %s2995_s10, %s2995_s10 }
  0x2f   : > { %p2998_p13 = pnand %p2996_p1, %p2934_p12  ;;  %p3005_p10 = por %p3004_p5, %p3003_p3 }
  0x31   : > { %p2999_p0 = pneg %p2998_p13 }
  0x33   : > { %p3006_p7 = pnand %p3005_p10, %p2999_p0 }
  0x35   : > { %3009 = shalt.err (!%p3006_p7)
}
  0x36   : > { %2797 = dma.hbm_to_vmem [thread:$0]  (!%p3243_p11), %s3712_s3, 512, %s237_s16, [#allocation6], %s3718_s18, %s3718_s18, %s3719_s19  }
  0x37   : > { %s3143_s14 = smov [#allocation10]  }
  0x38   : > { %s262_s15 = sshll.u32 %s3143_s14, 4  ;;  %s263_s15 = int_to_ptr.vmem [resolvable:$true] %s262_s15 }
  0x39   : > { %s3021_s17 = scalar_lea.vmem %s263_s15, 512  ;;  %p3029_p0 = scmp.lt.s32.totalorder %s263_s15, %s263_s15 }
  0x3a   : > { %p3022_p1 = scmp.ne.s32.totalorder %s263_s15, %s3021_s17  ;;  %p3030_p3 = scmp.lt.s32.totalorder %s3021_s17, %s3021_s17 }
  0x3c   : > { %p3024_p9 = pnand %p3022_p1, %p2934_p12  ;;  %p3031_p5 = por %p3030_p3, %p3029_p0 }
  0x3e   : > { %p3025_p13 = pneg %p3024_p9 }
  0x40   : > { %p3032_p10 = pnand %p3031_p5, %p3025_p13 }
  0x42   : > { %3035 = shalt.err (!%p3032_p10)
}
  0x43   : > { %2803 = dma.hbm_to_vmem [thread:$0]  (!%p3243_p11), %s3714_s5, 512, %s263_s15, [#allocation9], %s3718_s18, %s3718_s18, %s3719_s19  }
  0x44   : > { %s3294_s21 = sadd.s32 1, %s3136_s27   ;;  %s32_s12 = sadd.s32 1, %s3132_s26 }
  0x45   : > { %s29_s22 = ssub.s32 %s3136_s27, %s3294_s21  ;;  %p39_p12 = scmp.ne.s32.totalorder %s3132_s26, %s3128_s25 }
  0x46   : > { %p30_p7 = scmp.eq.s32.totalorder %s29_s22, 0  ;;  %p40_p1 = scmp.eq.s32.totalorder %s3136_s27, 0 }
  0x47   : > { %p3304_p9 = por %p195_p2, %p39_p12  ;;  %p2816_p13 = scmp.lt.s32.totalorder %s3136_s27, 2 }
  0x48   : > { %s3310_s29 = scalar_select %p30_p7, %s3132_s26, %s32_s12  }
  0x49   : > { %s3729_s23 = scalar_select %p3304_p9, 1, 0 }
  0x4a   : > { %p41_p0 = por %p40_p1, %p39_p12  ;;  %s279_s10 = sand.u32 1, %s3132_s26  }
  0x4b   : > { %s2513_s11 = sshll.u32 %s279_s10, 5  ;;  %s2569_s13 = sshll.u32 %s3136_s27, 9 }
  0x4c   : > { %s3317_s17 = scalar_lea.hbm %s3709_s0, %s2569_s13  ;;  %s283_s16 = scalar_lea.vmem [#allocation2], %s2513_s11 }
  0x4d   : > { %s290_s20 = sshll.u32 %s283_s16, 4  ;;  %p3321_p2 = pnand %p2816_p13, %p41_p0  ;;  %s3319_s20 = int_to_ptr.vmem [resolvable:$true] %s290_s20 }
  0x4e   : > { %s3325_s12 = scalar_lea.sflag [#allocation3], %s279_s10  ;;  %s3036_s18 = scalar_lea.hbm %s3317_s17, 512 }
  0x4f   : > { %p3037_p11 = scmp.ne.s32.totalorder %s3317_s17, %s3036_s18  ;;  %p3038_p3 = pneg %p3321_p2 }
  0x50   : > { %s3041_s11 = scalar_lea.hbm %s3709_s0, 1024  ;;  %p3042_p12 = scmp.lt.s32.totalorder %s3317_s17, %s3709_s0 }
  0x51   : > { %p3039_p5 = pnand %p3038_p3, %p3037_p11  ;;  %p3043_p7 = scmp.lt.s32.totalorder %s3041_s11, %s3036_s18 }
  0x53   : > { %p3040_p10 = pneg %p3039_p5  ;;  %p3044_p1 = por %p3043_p7, %p3042_p12 }
  0x55   : > { %p3045_p13 = pnand %p3044_p1, %p3040_p10 }
  0x57   : > { %3048 = shalt.err (!%p3045_p13)
}
  0x58   : > { %s3049_s10 = scalar_lea.vmem %s3319_s20, 512  ;;  %s3144_s19 = smov [#allocation2]  }
  0x59   : > { %p3050_p0 = scmp.ne.s32.totalorder %s3319_s20, %s3049_s10  ;;  %s3054_s1 = sshll.u32 %s3144_s19, 4  ;;  %s3055_s1 = int_to_ptr.vmem [resolvable:$false] %s3054_s1 }
  0x5a   : > { %s3056_s13 = scalar_lea.vmem %s3055_s1, 1024  ;;  %p3057_p5 = scmp.lt.s32.totalorder %s3319_s20, %s3055_s1 }
  0x5b   : > { %p3052_p6 = pnand %p3050_p0, %p3038_p3  ;;  %p3058_p9 = scmp.lt.s32.totalorder %s3056_s13, %s3049_s10 }
  0x5d   : > { %p3053_p11 = pneg %p3052_p6  ;;  %p3059_p4 = por %p3058_p9, %p3057_p5 }
  0x5f   : > { %p3060_p8 = pnand %p3059_p4, %p3053_p11 }
  0x61   : > { %3063 = shalt.err (!%p3060_p8)
}
  0x62   : > { %s3731_s18 = smov 8   ;;  %s3732_s14 = smov 128  }
  0x63   : > { %2807 = dma.hbm_to_vmem [thread:$0]  (!%p3321_p2), %s3317_s17, 512, %s3319_s20, %s3325_s12, %s3732_s14, %s3732_s14, %s3731_s18  }
  0x64   : > { %p3733_p6 = scmp.ne.s32.totalorder %s3726_s9, 0 }
  0x65   : > { %s3352_s19 = sand.u32 (!%p3733_p6), 1, %s3128_s25   ;;  %p3734_p4 = scmp.ne.s32.totalorder (!%p3733_p6), %s3724_s30, 0 }
  0x66   : > { %302 = sbr.rel (%p3733_p6) target bundleno = 2657 (0xa61), region = 48  ;;  %s2517_s1 = sshll.u32 (!%p3733_p6), %s3352_s19, 5 }
  0x67   : > { %s305_s11 = scalar_lea.sflag (!%p3733_p6), [#allocation3], %s3352_s19  ;;  %s308_s22 = scalar_lea.vmem (!%p3733_p6), [#allocation2], %s2517_s1 }
  0x6b   : > { %3107 = dma.done.wait (%p3734_p4), %s305_s11, 512  }
  0x6c   : > { %3109 = vsyncadd (%p3734_p4), %s305_s11, 4294966784  ;;  %p3735_p8 = scmp.eq.s32.totalorder %s3215_s28, 0 }
  0x6e   : > { %3111 = dma.done.wait (%p3735_p8), [#allocation6], 1024   ;;  %p3736_p9 = pmov %p3735_p8 }
  0x6f   : > { %p3737_p2 = pmov %p3735_p8 }
  0x70   : > { %3113 = vsyncadd (%p3736_p9), [#allocation6], 4294966272 }
  0x71   : > { %3115 = dma.done.wait (%p3737_p2), [#allocation9], 1024   ;;  %p3738_p3 = pmov %p3737_p2 }
  0x72   : > { %vm373_vm0 = vcmask 261120   ;;  %v366_v0 = vld [vmem:[#allocation5 + $0x18] sm:$0xff]  ;;  %v365_v1 = vld [vmem:[#allocation5 + $0x10] sm:$0xff]  ;;  %v3370_v2 = vld [vmem:[%s308_s22] sm:$0xff]  ;;  %v3145_v8 = vmov 0.0   ;;  %vm3146_vm1 = vmmov 0  }
  0x73   : > { %3117 = vsyncadd (%p3738_p3), [#allocation9], 4294966272  ;;  %2635 = vmatprep.subr.mxu0 %v366_v0  ;;  %v364_v3 = vld [vmem:[#allocation5 + $0x8] sm:$0xff]  ;;  %2643 = vmatprep.mubr.msk.f32.mxu0 %vm373_vm0, %v3370_v2  ;;  %v363_v4 = vld [vmem:[#allocation5] sm:$0xff]  ;;  %s3147_s17 = smov 112   ;;  %s3148_s20 = smov 96  }
  0x74   : > { %2636 = vmatpush3.msra.mxu0 %v366_v0  ;;  %v3374_v5 = vld [vmem:[%s308_s22 + $0x8] sm:$0xff]  ;;  %v3376_v6 = vld [vmem:[%s308_s22 + $0x10] sm:$0xff]  ;;  %v3382_v7 = vld [vmem:[%s308_s22 + $0x18] sm:$0xff]  ;;  %2649 = vmatprep.subr.mxu1 %v3145_v8  ;;  %vm485_vm2 = vcmask 130048   ;;  %vm1092_vm3 = vcmask 64512   ;;  %s3149_s12 = smov 64  }
  0x75   : > { %2637 = vmatprep.subr.mxu0 %v365_v1  ;;  %2651 = vmatprep.mubr.msk.f32.mxu1 %vm3146_vm1, %v3145_v8  ;;  %v2523_v10 = vld [vmem:[%s3711_s2] ss:$0 sm:$0xff]  ;;  %s3150_s15 = smov 16   ;;  %s354_s13 = scalar_lea.vmem [#allocation11], %s2517_s1 }
  0x76   : > { %2638 = vmatpush3.msra.mxu0 %v365_v1  ;;  %s2570_s18 = sshll.u32 %s3215_s28, 9  ;;  %s2395_s14 = sshll.u32 %s354_s13, 4  ;;  %s3664_s14 = int_to_ptr.vmem [resolvable:$true] %s2395_s14 }
  0x77   : > { %2639 = vmatprep.subr.mxu0 %v364_v3  ;;  %s3662_s30 = scalar_lea.hbm %s3716_s7, %s2570_s18  ;;  %s2382_s1 = scalar_lea.sflag [#allocation4], %s3352_s19 }
  0x78   : > { %2640 = vmatpush3.msra.mxu0 %v364_v3  ;;  %s3064_s28 = scalar_lea.vmem %s3664_s14, 512  ;;  %p3739_p12 = scmp.ne.s32.totalorder %s3729_s23, 0 }
  0x79   : > { %2641 = vmatprep.subr.mxu0 %v363_v4  ;;  %p3065_p10 = scmp.ne.s32.totalorder %s3664_s14, %s3064_s28  ;;  %s3151_s9 = smov [#allocation11]  }
  0x7a   : > { %2642 = vmatpush3.msra.mxu0 %v363_v4 }
  0x7b   : > { %2644 = vmatmul.mubr.msk.f32.vlgmr.msra.gmra.mxu0 %vm373_vm0, %v3374_v5  ;;  %2664 = vmatprep.subr.mxu0 %v3145_v8  ;;  %p3066_p7 = pnand %p3065_p10, %p3739_p12 }
  0x7c   : > { %2646 = vmatprep.mubr.msk.f32.mxu0 %vm373_vm0, %v3376_v6 }
  0x7d   : > { %p3067_p1 = pneg %p3066_p7 }
  0x7f   : > { %2647 = vmatmul.mubr.msk.f32.gmra.mxu0 %vm373_vm0, %v3382_v7 }
  0x80   : > { %2666 = vmatprep.mubr.msk.f32.mxu0 %vm3146_vm1, %v3145_v8 }
 0x13b   : > { %v2645_v9 = vpop.f32.mrf.mxu0 }
 0x13c   : > { %v3398_v15 = vadd.f32 %v2645_v9, %v2523_v10 }
 0x13d   : > { %v452_v11 = vpop.f32.mrf.mxu0 }
 0x13e   : > { %v3395_v12 = vadd.f32 %v2523_v10, %v452_v11 }
 0x13f   : > { %v2648_v13 = vpop.f32.mrf.mxu0 }
 0x140   : > { %475 = vrot.lane.b32.xlu0 %v3395_v12, %s3147_s17  ;;  %v3404_v17 = vadd.f32 %v2648_v13, %v2523_v10 }
 0x141   : > { %v462_v14 = vpop.f32.mrf.mxu0 }
 0x142   : > { %v3400_v16 = vadd.f32 %v2523_v10, %v462_v14 }
 0x144   : > { %479 = vrot.lane.b32.xlu1 %v3400_v16, %s3147_s17  ;;  %477 = vrot.lane.b32.xlu0 %v3398_v15, %s3147_s17 }
 0x148   : > { %481 = vrot.lane.b32.xlu1 %v3404_v17, %s3147_s17  ;;  %483 = vrot.lane.b32.xlu0 %v3395_v12, %s3148_s20  ;;  %s3068_s17 = sshll.u32 %s3151_s9, 4  ;;  %s3069_s17 = int_to_ptr.vmem [resolvable:$false] %s3068_s17 }
 0x149   : > { %p3071_p13 = scmp.lt.s32.totalorder %s3664_s14, %s3069_s17 }
 0x14c   : > { %560 = vrot.lane.b32.xlu1 %v3398_v15, %s3148_s20  ;;  %636 = vrot.lane.b32.xlu0 %v3400_v16, %s3148_s20 }
 0x150   : > { %712 = vrot.lane.b32.xlu1 %v3404_v17, %s3148_s20 }
 0x1b2   : > { %v3411_v18 = vpop.permute.xlu0 %475 }
 0x1b3   : > { %788 = vrot.lane.b32.xlu0 %v3411_v18, %s3148_s20 }
 0x1b6   : > { %v3414_v19 = vpop.permute.xlu1 %479  ;;  %v3416_v20 = vpop.permute.xlu0 %477 }
 0x1b7   : > { %940 = vrot.lane.b32.xlu0 %v3414_v19, %s3148_s20  ;;  %864 = vrot.lane.b32.xlu1 %v3416_v20, %s3148_s20 }
 0x1ba   : > { %v3420_v21 = vpop.permute.xlu1 %481  ;;  %v484_v22 = vpop.permute.xlu0 %483 }
 0x1bb   : > { %1016 = vrot.lane.b32.xlu1 %v3420_v21, %s3148_s20  ;;  %2650 = vmatpush3.xpose.msk.msra.mxu1 %vm485_vm2, %v484_v22  ;;  %s3070_s20 = scalar_lea.vmem %s3069_s17, 1024 }
 0x1bc   : > { %2654 = vmatprep.subr.mxu1 %v3145_v8  ;;  %p3072_p0 = scmp.lt.s32.totalorder %s3070_s20, %s3064_s28 }
 0x1be   : > { %v561_v23 = vpop.permute.xlu1 %560  ;;  %2652 = vmatmul.mubr.msk.f32.vlgmr.msra.gmra.mxu1 %vm485_vm2, %v3395_v12  ;;  %v637_v24 = vpop.permute.xlu0 %636  ;;  %p3073_p11 = por %p3072_p0, %p3071_p13 }
 0x1bf   : > { %2655 = vmatpush3.xpose.msk.msra.mxu1 %vm485_vm2, %v561_v23  ;;  %2656 = vmatprep.mubr.msk.f32.mxu1 %vm3146_vm1, %v3145_v8 }
 0x1c0   : > { %2659 = vmatprep.subr.mxu1 %v3145_v8  ;;  %p3074_p5 = pnand %p3073_p11, %p3067_p1 }
 0x1c2   : > { %v713_v25 = vpop.permute.xlu1 %712  ;;  %2657 = vmatmul.mubr.msk.f32.vlgmr.msra.gmra.mxu1 %vm485_vm2, %v3398_v15 }
 0x1c3   : > { %2660 = vmatpush3.xpose.msk.msra.mxu1 %vm485_vm2, %v637_v24  ;;  %2665 = vmatpush3.xpose.msk.msra.mxu0 %vm485_vm2, %v713_v25 }
 0x1c4   : > { %2661 = vmatprep.mubr.msk.f32.mxu1 %vm3146_vm1, %v3145_v8  ;;  %2669 = vmatprep.subr.mxu1 %v3145_v8 }
 0x1c5   : > { %2674 = vmatprep.subr.mxu0 %v3145_v8 }
 0x1c6   : > { %2662 = vmatmul.mubr.msk.f32.vlgmr.msra.gmra.mxu1 %vm485_vm2, %v3400_v16  ;;  %2667 = vmatmul.mubr.msk.f32.vlgmr.msra.gmra.mxu0 %vm485_vm2, %v3404_v17 }
 0x1c7   : > { %2671 = vmatprep.mubr.msk.f32.mxu1 %vm3146_vm1, %v3145_v8  ;;  %2676 = vmatprep.mubr.msk.f32.mxu0 %vm3146_vm1, %v3145_v8 }
 0x225   : > { %v789_v26 = vpop.permute.xlu0 %788 }
 0x226   : > { %2670 = vmatpush3.xpose.msk.msra.mxu1 %vm485_vm2, %v789_v26 }
 0x227   : > { %2679 = vmatprep.subr.mxu1 %v3145_v8 }
 0x229   : > { %v865_v27 = vpop.permute.xlu1 %864  ;;  %2672 = vmatmul.mubr.msk.f32.vlgmr.msra.gmra.mxu1 %vm485_vm2, %v3411_v18  ;;  %v941_v28 = vpop.permute.xlu0 %940 }
 0x22a   : > { %2675 = vmatpush3.xpose.msk.msra.mxu0 %vm485_vm2, %v865_v27  ;;  %2680 = vmatpush3.xpose.msk.msra.mxu1 %vm485_vm2, %v941_v28 }
 0x22b   : > { %2681 = vmatprep.mubr.msk.f32.mxu1 %vm3146_vm1, %v3145_v8  ;;  %2684 = vmatprep.subr.mxu0 %v3145_v8 }
 0x22c   : > { %2689 = vmatprep.subr.mxu1 %v3145_v8 }
 0x22d   : > { %2677 = vmatmul.mubr.msk.f32.vlgmr.msra.gmra.mxu0 %vm485_vm2, %v3416_v20  ;;  %v1017_v29 = vpop.permute.xlu1 %1016  ;;  %2682 = vmatmul.mubr.msk.f32.vlgmr.msra.gmra.mxu1 %vm485_vm2, %v3414_v19 }
 0x22e   : > { %2685 = vmatpush3.xpose.msk.msra.mxu0 %vm485_vm2, %v1017_v29  ;;  %2686 = vmatprep.mubr.msk.f32.mxu0 %vm3146_vm1, %v3145_v8 }
 0x22f   : > { %2694 = vmatprep.subr.mxu0 %v3145_v8  ;;  %2691 = vmatprep.mubr.msk.f32.mxu1 %vm3146_vm1, %v3145_v8 }
 0x231   : > { %2687 = vmatmul.mubr.msk.f32.vlgmr.msra.gmra.mxu0 %vm485_vm2, %v3420_v21 }
 0x232   : > { %2696 = vmatprep.mubr.msk.f32.mxu0 %vm3146_vm1, %v3145_v8 }
 0x27e   : > { %v556_v30 = vpop.f32.mrf.mxu1 }
 0x27f   : > { %v1093_v31 = vsel %vm1092_vm3, %v556_v30, -inf }
 0x280   : > { %1094 = vmax.xlane.f32.xlu0 %v1093_v31  ;;  %v2653_v32 = vpop.f32.mrf.mxu1 }
 0x282   : > { %v632_v33 = vpop.f32.mrf.mxu1 }
 0x283   : > { %v1096_v34 = vsel %vm1092_vm3, %v632_v33, -inf }
 0x284   : > { %1097 = vmax.xlane.f32.xlu1 %v1096_v34  ;;  %v2658_v35 = vpop.f32.mrf.mxu1 }
 0x286   : > { %v708_v36 = vpop.f32.mrf.mxu1  ;;  %v784_v37 = vpop.f32.mrf.mxu0 }
 0x287   : > { %v1099_v38 = vsel %vm1092_vm3, %v708_v36, -inf  ;;  %v1102_v41 = vsel %vm1092_vm3, %v784_v37, -inf }
 0x288   : > { %v2668_v39 = vpop.f32.mrf.mxu0  ;;  %1100 = vmax.xlane.f32.xlu0 %v1099_v38  ;;  %v2663_v40 = vpop.f32.mrf.mxu1 }
 0x28c   : > { %1103 = vmax.xlane.f32.xlu0 %v1102_v41 }
 0x2e9   : > { %v860_v42 = vpop.f32.mrf.mxu1 }
 0x2ea   : > { %v1105_v43 = vsel %vm1092_vm3, %v860_v42, -inf }
 0x2eb   : > { %1106 = vmax.xlane.f32.xlu1 %v1105_v43  ;;  %v2673_v44 = vpop.f32.mrf.mxu1 }
 0x2ed   : > { %v936_v45 = vpop.f32.mrf.mxu0  ;;  %v1012_v46 = vpop.f32.mrf.mxu1 }
 0x2ee   : > { %v1108_v47 = vsel %vm1092_vm3, %v936_v45, -inf  ;;  %v1111_v48 = vsel %vm1092_vm3, %v1012_v46, -inf }
 0x2ef   : > { %v2678_v49 = vpop.f32.mrf.mxu0  ;;  %1109 = vmax.xlane.f32.xlu0 %v1108_v47  ;;  %1112 = vmax.xlane.f32.xlu1 %v1111_v48  ;;  %v2683_v50 = vpop.f32.mrf.mxu1 }
 0x2f1   : > { %v1088_v51 = vpop.f32.mrf.mxu0 }
 0x2f2   : > { %v1114_v52 = vsel %vm1092_vm3, %v1088_v51, -inf }
 0x2f3   : > { %v2688_v53 = vpop.f32.mrf.mxu0  ;;  %1115 = vmax.xlane.f32.xlu0 %v1114_v52 }
 0x300   : > { %1181 = vrot.lane.b32.xlu1 %v3395_v12, %s3149_s12 }
 0x304   : > { %1333 = vrot.lane.b32.xlu1 %v3400_v16, %s3149_s12 }
 0x308   : > { %1409 = vrot.lane.b32.xlu1 %v3404_v17, %s3149_s12 }
 0x309   : > { %1257 = vrot.lane.b32.xlu0 %v3398_v15, %s3149_s12  ;;  %v1095_v54 = vpop.xlane.xlu0 %1094 }
 0x30a   : > { %v1117_v58 = vsub.f32 %v556_v30, %v1095_v54 }
 0x30c   : > { %1561 = vrot.lane.b32.xlu1 %v3416_v20, %s3149_s12  ;;  %v1125_v62 = vmul.f32 1.442695, %v1117_v58 }
 0x30d   : > { %1485 = vrot.lane.b32.xlu0 %v3411_v18, %s3149_s12  ;;  %v1098_v56 = vpop.xlane.xlu1 %1097 }
 0x30e   : > { %v1118_v60 = vsub.f32 %v632_v33, %v1098_v56 }
 0x310   : > { %v1127_v63 = vmul.f32 1.442695, %v1118_v60 }
 0x311   : > { %v1101_v55 = vpop.xlane.xlu0 %1100 }
 0x312   : > { %v1119_v0 = vsub.f32 %v708_v36, %v1101_v55 }
 0x314   : > { %v1129_v1 = vmul.f32 1.442695, %v1119_v0 }
 0x315   : > { %v1104_v57 = vpop.xlane.xlu0 %1103 }
 0x316   : > { %v1120_v59 = vsub.f32 %v784_v37, %v1104_v57 }
 0x318   : > { %v1131_v61 = vmul.f32 1.442695, %v1120_v59 }
 0x31a   : > { %2868 = vpow2.f32 %v1131_v61 }
 0x31b   : > { %2870 = vpow2.f32 %v1125_v62 }
 0x31c   : > { %2872 = vpow2.f32 %v1127_v63 }
 0x31d   : > { %2874 = vpow2.f32 %v1129_v1 }
 0x327   : > { %v3491_v3 = vpop.eup %2868 }
 0x328   : > { %v2871_v4 = vpop.eup %2870  ;;  %v1150_v9 = vsel %vm1092_vm3, %v3491_v3, 0.0 }
 0x329   : > { %v2873_v10 = vpop.eup %2872  ;;  %v1141_v11 = vsel %vm1092_vm3, %v2871_v4, 0.0 }
 0x32a   : > { %v1144_v12 = vsel %vm1092_vm3, %v2873_v10, 0.0  ;;  %v3497_v13 = vpop.eup %2874 }
 0x32b   : > { %v1147_v14 = vsel %vm1092_vm3, %v3497_v13, 0.0 }
 0x32c   : > { %1151 = vadd.xlane.f32.xlu0 %v1150_v9  ;;  %v1811_v9 = vld [vmem:[#allocation7 + $0x10] sm:$0xff] }
 0x330   : > { %1142 = vadd.xlane.f32.xlu1 %v1141_v11  ;;  %1145 = vadd.xlane.f32.xlu0 %v1144_v12 }
 0x334   : > { %1148 = vadd.xlane.f32.xlu1 %v1147_v14 }
 0x374   : > { %v1107_v15 = vpop.xlane.xlu1 %1106 }
 0x375   : > { %v1121_v16 = vsub.f32 %v860_v42, %v1107_v15 }
 0x377   : > { %v1133_v17 = vmul.f32 1.442695, %v1121_v16 }
 0x378   : > { %v1113_v18 = vpop.xlane.xlu1 %1112  ;;  %v1110_v20 = vpop.xlane.xlu0 %1109 }
 0x379   : > { %2876 = vpow2.f32 %v1133_v17  ;;  %v1123_v22 = vsub.f32 %v1012_v46, %v1113_v18  ;;  %v1122_v23 = vsub.f32 %v936_v45, %v1110_v20  ;;  %v1810_v18 = vld [vmem:[#allocation7 + $0x8] sm:$0xff] }
 0x37b   : > { %v1137_v24 = vmul.f32 1.442695, %v1123_v22  ;;  %v1135_v25 = vmul.f32 1.442695, %v1122_v23 }
 0x37c   : > { %v1182_v26 = vpop.permute.xlu1 %1181  ;;  %v1116_v27 = vpop.xlane.xlu0 %1115 }
 0x37d   : > { %2878 = vpow2.f32 %v1137_v24  ;;  %v1124_v28 = vsub.f32 %v1088_v51, %v1116_v27  ;;  %2690 = vmatpush3.msra.mxu1 %v1182_v26 }
 0x37e   : > { %2880 = vpow2.f32 %v1135_v25  ;;  %2699 = vmatprep.subr.mxu1 %v3145_v8 }
 0x37f   : > { %v1139_v29 = vmul.f32 1.442695, %v1124_v28 }
 0x380   : > { %v1258_v30 = vpop.permute.xlu0 %1257  ;;  %v1334_v39 = vpop.permute.xlu1 %1333 }
 0x381   : > { %2882 = vpow2.f32 %v1139_v29  ;;  %2695 = vmatpush3.msra.mxu0 %v1258_v30 }
 0x382   : > { %2704 = vmatprep.subr.mxu0 %v3145_v8 }
 0x384   : > { %v1410_v40 = vpop.permute.xlu1 %1409  ;;  %v1486_v41 = vpop.permute.xlu0 %1485 }
 0x386   : > { %v2877_v31 = vpop.eup %2876 }
 0x387   : > { %v1153_v32 = vsel %vm1092_vm3, %v2877_v31, 0.0 }
 0x388   : > { %1154 = vadd.xlane.f32.xlu1 %v1153_v32  ;;  %v1562_v42 = vpop.permute.xlu1 %1561 }
 0x38a   : > { %v3504_v33 = vpop.eup %2878 }
 0x38b   : > { %v3506_v34 = vpop.eup %2880  ;;  %v1159_v35 = vsel %vm1092_vm3, %v3504_v33, 0.0 }
 0x38c   : > { %1160 = vadd.xlane.f32.xlu1 %v1159_v35  ;;  %v1156_v36 = vsel %vm1092_vm3, %v3506_v34, 0.0 }
 0x38d   : > { %1157 = vadd.xlane.f32.xlu0 %v1156_v36 }
 0x38e   : > { %v3512_v37 = vpop.eup %2882 }
 0x38f   : > { %v1162_v38 = vsel %vm1092_vm3, %v3512_v37, 0.0 }
 0x391   : > { %1163 = vadd.xlane.f32.xlu0 %v1162_v38 }
 0x39d   : > { %1713 = vrot.lane.b32.xlu1 %v3420_v21, %s3149_s12 }
 0x3a7   : > { %1637 = vrot.lane.b32.xlu0 %v3414_v19, %s3149_s12 }
 0x3b5   : > { %v1152_v43 = vpop.xlane.xlu0 %1151 }
 0x3b9   : > { %v1143_v44 = vpop.xlane.xlu1 %1142  ;;  %v1146_v45 = vpop.xlane.xlu0 %1145 }
 0x3ba   : > { %2884 = vrcp.f32 %v1143_v44 }
 0x3bb   : > { %2886 = vrcp.f32 %v1146_v45 }
 0x3bc   : > { %2888 = vrcp.f32 %v1152_v43 }
 0x3bd   : > { %v1149_v46 = vpop.xlane.xlu1 %1148 }
 0x3be   : > { %2890 = vrcp.f32 %v1149_v46 }
 0x3c7   : > { %v2885_v47 = vpop.eup %2884 }
 0x3c8   : > { %v2887_v48 = vpop.eup %2886  ;;  %v1166_v49 = vmul.f32 %v2885_v47, %v2871_v4  ;;  %v1812_v4 = vld [vmem:[#allocation7 + $0x18] sm:$0xff] }
 0x3c9   : > { %v1168_v50 = vmul.f32 %v2887_v48, %v2873_v10  ;;  %v2889_v21 = vpop.eup %2888 }
 0x3ca   : > { %2692 = vmatmul.mubr.msk.f32.vlgmr.msra.gmra.mxu1 %vm1092_vm3, %v1166_v49  ;;  %v1172_v52 = vmul.f32 %v2889_v21, %v3491_v3 }
 0x3cb   : > { %v2891_v19 = vpop.eup %2890  ;;  %2697 = vmatmul.mubr.msk.f32.vlgmr.msra.gmra.mxu0 %vm1092_vm3, %v1168_v50  ;;  %2700 = vmatpush3.msra.mxu1 %v1334_v39 }
 0x3cc   : > { %2705 = vmatpush3.msra.mxu0 %v1410_v40  ;;  %2701 = vmatprep.mubr.msk.f32.mxu1 %vm3146_vm1, %v3145_v8  ;;  %v1170_v51 = vmul.f32 %v2891_v19, %v3497_v13  ;;  %v3563_v40 = vld [vmem:[%s3715_s6] sm:$0x7f] }
 0x3cd   : > { %2706 = vmatprep.mubr.msk.f32.mxu0 %vm3146_vm1, %v3145_v8  ;;  %2709 = vmatprep.subr.mxu1 %v3145_v8 }
 0x3ce   : > { %2714 = vmatprep.subr.mxu0 %v3145_v8  ;;  %2702 = vmatmul.mubr.msk.f32.vlgmr.msra.gmra.mxu1 %vm1092_vm3, %v1170_v51 }
 0x3cf   : > { %2707 = vmatmul.mubr.msk.f32.vlgmr.msra.gmra.mxu0 %vm1092_vm3, %v1172_v52  ;;  %2710 = vmatpush3.msra.mxu1 %v1486_v41 }
 0x3d0   : > { %2715 = vmatpush3.msra.mxu0 %v1562_v42  ;;  %2711 = vmatprep.mubr.msk.f32.mxu1 %vm3146_vm1, %v3145_v8 }
 0x3d1   : > { %2719 = vmatprep.subr.mxu1 %v3145_v8  ;;  %2716 = vmatprep.mubr.msk.f32.mxu0 %vm3146_vm1, %v3145_v8 }
 0x3d2   : > { %2724 = vmatprep.subr.mxu0 %v3145_v8 }
 0x411   : > { %v1155_v53 = vpop.xlane.xlu1 %1154 }
 0x412   : > { %2892 = vrcp.f32 %v1155_v53 }
 0x415   : > { %v1161_v54 = vpop.xlane.xlu1 %1160 }
 0x416   : > { %2894 = vrcp.f32 %v1161_v54  ;;  %v1158_v55 = vpop.xlane.xlu0 %1157 }
 0x417   : > { %2896 = vrcp.f32 %v1158_v55 }
 0x419   : > { %v1714_v0 = vpop.permute.xlu1 %1713 }
 0x41a   : > { %v1164_v56 = vpop.xlane.xlu0 %1163 }
 0x41b   : > { %2898 = vrcp.f32 %v1164_v56 }
 0x41e   : > { %v1638_v59 = vpop.permute.xlu0 %1637 }
 0x41f   : > { %v2893_v57 = vpop.eup %2892 }
 0x420   : > { %v1174_v58 = vmul.f32 %v2893_v57, %v2877_v31 }
 0x422   : > { %2712 = vmatmul.mubr.msk.f32.vlgmr.msra.gmra.mxu1 %vm1092_vm3, %v1174_v58 }
 0x423   : > { %v2895_v60 = vpop.eup %2894  ;;  %2720 = vmatpush3.msra.mxu1 %v1638_v59  ;;  %2721 = vmatprep.mubr.msk.f32.mxu1 %vm3146_vm1, %v3145_v8 }
 0x424   : > { %v2897_v61 = vpop.eup %2896  ;;  %v1178_v62 = vmul.f32 %v2895_v60, %v3504_v33  ;;  %2729 = vmatprep.subr.mxu1 %v1812_v4 }
 0x425   : > { %v1176_v63 = vmul.f32 %v2897_v61, %v3506_v34 }
 0x426   : > { %2722 = vmatmul.mubr.msk.f32.vlgmr.msra.gmra.mxu1 %vm1092_vm3, %v1178_v62 }
 0x427   : > { %2717 = vmatmul.mubr.msk.f32.vlgmr.msra.gmra.mxu0 %vm1092_vm3, %v1176_v63  ;;  %2730 = vmatpush3.msra.mxu1 %v1812_v4 }
 0x428   : > { %v2899_v1 = vpop.eup %2898  ;;  %2725 = vmatpush3.msra.mxu0 %v1714_v0  ;;  %2726 = vmatprep.mubr.msk.f32.mxu0 %vm3146_vm1, %v3145_v8  ;;  %v1809_v8 = vld [vmem:[#allocation7] sm:$0xff] }
 0x429   : > { %v1180_v3 = vmul.f32 %v2899_v1, %v3512_v37  ;;  %2731 = vmatprep.subr.mxu1 %v1811_v9  ;;  %v1813_v37 = vlaneseq }
 0x42a   : > { %2732 = vmatpush3.msra.mxu1 %v1811_v9 }
 0x42b   : > { %2727 = vmatmul.mubr.msk.f32.vlgmr.msra.gmra.mxu0 %vm1092_vm3, %v1180_v3  ;;  %2733 = vmatprep.subr.mxu1 %v1810_v18  ;;  %v3557_v38 = vshrl.u32 %v1813_v37, 7 }
 0x42c   : > { %2734 = vmatpush3.msra.mxu1 %v1810_v18 }
 0x42d   : > { %2735 = vmatprep.subr.mxu1 %v1809_v8  ;;  %v1815_v39 = vsub.s32 0, %v3557_v38 }
 0x42e   : > { %2736 = vmatpush3.msra.mxu1 %v1809_v8 }
 0x42f   : > { %v1816_v41 = vrot.slane %v3563_v40, %v1815_v39 }
 0x48a   : > { %v1253_v10 = vpop.f32.mrf.mxu1 }
 0x48b   : > { %v1329_v11 = vpop.f32.mrf.mxu0 }
 0x48c   : > { %v2693_v12 = vpop.f32.mrf.mxu1 }
 0x48d   : > { %v2698_v13 = vpop.f32.mrf.mxu0 }
 0x48e   : > { %v1405_v14 = vpop.f32.mrf.mxu1  ;;  %v1990_v13 = vld [vmem:[#allocation8 + $0x18] sm:$0xff] }
 0x48f   : > { %v1481_v15 = vpop.f32.mrf.mxu0  ;;  %2743 = vmatprep.subr.mxu0 %v1990_v13 }
 0x490   : > { %v2703_v16 = vpop.f32.mrf.mxu1  ;;  %2744 = vmatpush3.msra.mxu0 %v1990_v13 }
 0x491   : > { %v2708_v17 = vpop.f32.mrf.mxu0  ;;  %v1987_v16 = vld [vmem:[#allocation8] sm:$0xff] }
 0x4e2   : > { %v1557_v20 = vpop.f32.mrf.mxu1 }
 0x4e3   : > { %1793 = vrot.lane.b32.xlu0 %v1557_v20, %s3150_s15 }
 0x4e4   : > { %v2713_v22 = vpop.f32.mrf.mxu1 }
 0x4e6   : > { %v1709_v23 = vpop.f32.mrf.mxu1 }
 0x4e7   : > { %v1633_v24 = vpop.f32.mrf.mxu0  ;;  %1797 = vrot.lane.b32.xlu0 %v1709_v23, %s3150_s15 }
 0x4e8   : > { %1795 = vrot.lane.b32.xlu1 %v1633_v24, %s3150_s15  ;;  %v2723_v25 = vpop.f32.mrf.mxu1 }
 0x4e9   : > { %v2718_v26 = vpop.f32.mrf.mxu0 }
 0x4eb   : > { %v1785_v27 = vpop.f32.mrf.mxu0 }
 0x4ec   : > { %1799 = vrot.lane.b32.xlu1 %v1785_v27, %s3150_s15 }
 0x4ed   : > { %v2728_v28 = vpop.f32.mrf.mxu0 }
 0x555   : > { %v1794_v29 = vpop.permute.xlu0 %1793 }
 0x556   : > { %v1805_v30 = vsel %vm485_vm2, %v1253_v10, %v1794_v29 }
 0x557   : > { %2737 = vmatprep.mubr.msk.f32.mxu1 %vm373_vm0, %v1805_v30  ;;  %v1973_v30 = vsub.s32 1, %v3557_v38 }
 0x559   : > { %v1798_v31 = vpop.permute.xlu0 %1797 }
 0x55a   : > { %v1796_v32 = vpop.permute.xlu1 %1795  ;;  %v1807_v33 = vsel %vm485_vm2, %v1405_v14, %v1798_v31  ;;  %v1989_v14 = vld [vmem:[#allocation8 + $0x10] sm:$0xff] }
 0x55b   : > { %v1806_v34 = vsel %vm485_vm2, %v1329_v11, %v1796_v32  ;;  %2745 = vmatprep.subr.mxu0 %v1989_v14  ;;  %v1974_v32 = vrot.slane %v3563_v40, %v1973_v30 }
 0x55c   : > { %2738 = vmatmul.mubr.msk.f32.vlgmr.msra.gmra.mxu1 %vm373_vm0, %v1806_v34  ;;  %2746 = vmatpush3.msra.mxu0 %v1989_v14 }
 0x55d   : > { %2740 = vmatprep.mubr.msk.f32.mxu1 %vm373_vm0, %v1807_v33  ;;  %v1981_v33 = vsub.s32 2, %v3557_v38 }
 0x55e   : > { %v1800_v35 = vpop.permute.xlu1 %1799 }
 0x55f   : > { %v1808_v36 = vsel %vm485_vm2, %v1481_v15, %v1800_v35  ;;  %v1988_v15 = vld [vmem:[#allocation8 + $0x8] sm:$0xff]  ;;  %v1982_v37 = vrot.slane %v3563_v40, %v1981_v33 }
 0x560   : > { %2741 = vmatmul.mubr.msk.f32.gmra.mxu1 %vm373_vm0, %v1808_v36  ;;  %2747 = vmatprep.subr.mxu0 %v1988_v15 }
 0x561   : > { %2748 = vmatpush3.msra.mxu0 %v1988_v15 }
 0x562   : > { %2749 = vmatprep.subr.mxu0 %v1987_v16 }
 0x563   : > { %2750 = vmatpush3.msra.mxu0 %v1987_v16 }
 0x61c   : > { %v2739_v42 = vpop.f32.mrf.mxu1 }
 0x61d   : > { %v1901_v43 = vadd.f32 %v2739_v42, %v1816_v41 }
 0x61e   : > { %v1895_v44 = vpop.f32.mrf.mxu1 }
 0x61f   : > { %v1896_v45 = vadd.f32 %v1895_v44, %v1816_v41  ;;  %v1915_v46 = vadd.f32 %v1901_v43, %v3374_v5 }
 0x620   : > { %v2742_v47 = vpop.f32.mrf.mxu1 }
 0x621   : > { %v1921_v48 = vsel %vm373_vm0, %v1915_v46, 0.0  ;;  %v1914_v49 = vadd.f32 %v1896_v45, %v3370_v2  ;;  %v1911_v21 = vadd.f32 %v2742_v47, %v1816_v41 }
 0x622   : > { %1922 = vadd.xlane.f32.xlu1 %v1921_v48  ;;  %v1905_v50 = vpop.f32.mrf.mxu1 }
 0x623   : > { %v1906_v19 = vadd.f32 %v1905_v50, %v1816_v41  ;;  %v1918_v51 = vsel %vm373_vm0, %v1914_v49, 0.0  ;;  %v1917_v54 = vadd.f32 %v1911_v21, %v3382_v7 }
 0x624   : > { %1919 = vadd.xlane.f32.xlu0 %v1918_v51  ;;  %v2202_v51 = vld [vmem:[#allocation10 + $0x10] sm:$0xff] }
 0x625   : > { %v1916_v52 = vadd.f32 %v1906_v19, %v3376_v6  ;;  %v1927_v5 = vsel %vm373_vm0, %v1917_v54, 0.0  ;;  %v2203_v19 = vld [vmem:[#allocation10 + $0x18] sm:$0xff] }
 0x626   : > { %2757 = vmatprep.subr.mxu1 %v2203_v19 }
 0x627   : > { %v1924_v53 = vsel %vm373_vm0, %v1916_v52, 0.0  ;;  %2758 = vmatpush3.msra.mxu1 %v2203_v19 }
 0x628   : > { %1925 = vadd.xlane.f32.xlu0 %v1924_v53  ;;  %2759 = vmatprep.subr.mxu1 %v2202_v51  ;;  %v2200_v53 = vld [vmem:[#allocation10] sm:$0xff] }
 0x629   : > { %2760 = vmatpush3.msra.mxu1 %v2202_v51 }
 0x62c   : > { %1928 = vadd.xlane.f32.xlu0 %v1927_v5 }
 0x6ab   : > { %v1923_v55 = vpop.xlane.xlu1 %1922 }
 0x6ac   : > { %v1932_v56 = vmul.f32 0.03125, %v1923_v55 }
 0x6ad   : > { %v1920_v2 = vpop.xlane.xlu0 %1919 }
 0x6ae   : > { %v1936_v57 = vsub.f32 %v1915_v46, %v1932_v56  ;;  %v1931_v58 = vmul.f32 0.03125, %v1920_v2 }
 0x6b0   : > { %v1935_v59 = vsub.f32 %v1914_v49, %v1931_v58  ;;  %v1940_v60 = vmul.f32 %v1936_v57, %v1936_v57 }
 0x6b1   : > { %v1926_v61 = vpop.xlane.xlu0 %1925 }
 0x6b2   : > { %v1933_v62 = vmul.f32 0.03125, %v1926_v61  ;;  %v1946_v63 = vsel %vm373_vm0, %v1940_v60, 0.0  ;;  %v1939_v6 = vmul.f32 %v1935_v59, %v1935_v59 }
 0x6b3   : > { %1947 = vadd.xlane.f32.xlu0 %v1946_v63 }
 0x6b4   : > { %v1937_v0 = vsub.f32 %v1916_v52, %v1933_v62  ;;  %v1943_v7 = vsel %vm373_vm0, %v1939_v6, 0.0  ;;  %v2201_v52 = vld [vmem:[#allocation10 + $0x8] sm:$0xff] }
 0x6b5   : > { %1944 = vadd.xlane.f32.xlu1 %v1943_v7  ;;  %v1929_v1 = vpop.xlane.xlu0 %1928  ;;  %2761 = vmatprep.subr.mxu1 %v2201_v52 }
 0x6b6   : > { %v1934_v3 = vmul.f32 0.03125, %v1929_v1  ;;  %v1941_v4 = vmul.f32 %v1937_v0, %v1937_v0  ;;  %2762 = vmatpush3.msra.mxu1 %v2201_v52 }
 0x6b7   : > { %2763 = vmatprep.subr.mxu1 %v2200_v53 }
 0x6b8   : > { %v1938_v9 = vsub.f32 %v1917_v54, %v1934_v3  ;;  %v1949_v10 = vsel %vm373_vm0, %v1941_v4, 0.0  ;;  %2764 = vmatpush3.msra.mxu1 %v2200_v53  ;;  %v1993_v54 = vsub.s32 3, %v3557_v38 }
 0x6b9   : > { %1950 = vadd.xlane.f32.xlu1 %v1949_v10 }
 0x6ba   : > { %v1942_v11 = vmul.f32 %v1938_v9, %v1938_v9  ;;  %v1994_v5 = vrot.slane %v3563_v40, %v1993_v54 }
 0x6bc   : > { %v1952_v12 = vsel %vm373_vm0, %v1942_v11, 0.0 }
 0x6bd   : > { %1953 = vadd.xlane.f32.xlu0 %v1952_v12 }
 0x73c   : > { %v1948_v17 = vpop.xlane.xlu0 %1947 }
 0x73d   : > { %v1956_v18 = vmul.f32 0.03125, %v1948_v17 }
 0x73e   : > { %v1945_v8 = vpop.xlane.xlu1 %1944 }
 0x73f   : > { %v1960_v20 = vadd.f32 1e-05, %v1956_v18  ;;  %v1955_v22 = vmul.f32 0.03125, %v1945_v8 }
 0x741   : > { %2900 = vrsqrt.f32 %v1960_v20  ;;  %v1959_v23 = vadd.f32 1e-05, %v1955_v22 }
 0x742   : > { %v1951_v24 = vpop.xlane.xlu1 %1950 }
 0x743   : > { %2902 = vrsqrt.f32 %v1959_v23  ;;  %v1957_v25 = vmul.f32 0.03125, %v1951_v24 }
 0x745   : > { %v1961_v26 = vadd.f32 1e-05, %v1957_v25 }
 0x746   : > { %v1954_v27 = vpop.xlane.xlu0 %1953 }
 0x747   : > { %2904 = vrsqrt.f32 %v1961_v26  ;;  %v1958_v28 = vmul.f32 0.03125, %v1954_v27 }
 0x749   : > { %v1962_v29 = vadd.f32 1e-05, %v1958_v28 }
 0x74b   : > { %2906 = vrsqrt.f32 %v1962_v29 }
 0x74e   : > { %v2901_v31 = vpop.eup %2900 }
 0x74f   : > { %v1968_v34 = vmul.f32 %v2901_v31, %v1936_v57 }
 0x750   : > { %v2903_v35 = vpop.eup %2902 }
 0x751   : > { %v1967_v36 = vmul.f32 %v2903_v35, %v1935_v59  ;;  %v1976_v39 = vmul.f32 %v1974_v32, %v1968_v34 }
 0x753   : > { %v1975_v41 = vmul.f32 %v1974_v32, %v1967_v36  ;;  %v3584_v45 = vadd.f32 %v1982_v37, %v1976_v39 }
 0x754   : > { %v2905_v42 = vpop.eup %2904 }
 0x755   : > { %v3582_v43 = vadd.f32 %v1982_v37, %v1975_v41  ;;  %v1969_v44 = vmul.f32 %v2905_v42, %v1937_v0 }
 0x757   : > { %2751 = vmatprep.mubr.msk.f32.mxu0 %vm373_vm0, %v3582_v43  ;;  %v1977_v46 = vmul.f32 %v1974_v32, %v1969_v44 }
 0x758   : > { %v2907_v47 = vpop.eup %2906  ;;  %2752 = vmatmul.mubr.msk.f32.vlgmr.msra.gmra.mxu0 %vm373_vm0, %v3584_v45 }
 0x759   : > { %v3590_v48 = vadd.f32 %v1982_v37, %v1977_v46  ;;  %v1970_v49 = vmul.f32 %v2907_v47, %v1938_v9 }
 0x75b   : > { %2754 = vmatprep.mubr.msk.f32.mxu0 %vm373_vm0, %v3590_v48  ;;  %v1978_v50 = vmul.f32 %v1974_v32, %v1970_v49 }
 0x75d   : > { %v3594_v21 = vadd.f32 %v1982_v37, %v1978_v50 }
 0x75f   : > { %2755 = vmatmul.mubr.msk.f32.gmra.mxu0 %vm373_vm0, %v3594_v21 }
 0x818   : > { %v2753_v55 = vpop.f32.mrf.mxu0 }
 0x819   : > { %v3600_v56 = vadd.f32 %v2753_v55, %v1994_v5 }
 0x81a   : > { %v2073_v2 = vpop.f32.mrf.mxu0 }
 0x81b   : > { %v3603_v57 = vmul.f32 0.70710677, %v3600_v56  ;;  %v3605_v58 = vadd.f32 %v2073_v2, %v1994_v5 }
 0x81d   : > { %v2101_v59 = vand.u32 2147483647, %v3603_v57  ;;  %v3609_v60 = vmul.f32 0.70710677, %v3605_v58  ;;  %vm2181_vm4 = vcmp.lt.f32.partialorder %v3603_v57, 0.0  ;;  %v2093_v57 = vmul.f32 0.5, %v3600_v56 }
 0x81f   : > { %v2105_v61 = vmul.f32 0.3275911, %v2101_v59  ;;  %v2100_v62 = vand.u32 2147483647, %v3609_v60  ;;  %v2756_v63 = vpop.f32.mrf.mxu0  ;;  %v2157_v16 = vmul.f32 %v2101_v59, %v2101_v59  ;;  %vm2180_vm5 = vcmp.lt.f32.partialorder %v3609_v60, 0.0 }
 0x820   : > { %v3612_v6 = vadd.f32 %v2756_v63, %v1994_v5 }
 0x821   : > { %v2109_v0 = vadd.f32 1.0, %v2105_v61  ;;  %v2104_v7 = vmul.f32 0.3275911, %v2100_v62  ;;  %v2083_v1 = vpop.f32.mrf.mxu0  ;;  %v2156_v18 = vmul.f32 %v2100_v62, %v2100_v62  ;;  %v2161_v8 = vsub.f32 0.0, %v2157_v16 }
 0x822   : > { %v3615_v3 = vmul.f32 0.70710677, %v3612_v6  ;;  %v3617_v4 = vadd.f32 %v2083_v1, %v1994_v5  ;;  %v2095_v56 = vmul.f32 0.5, %v3612_v6 }
 0x823   : > { %2908 = vrcp.f32 %v2109_v0  ;;  %v2108_v9 = vadd.f32 1.0, %v2104_v7  ;;  %v2160_v22 = vsub.f32 0.0, %v2156_v18  ;;  %v2166_v25 = vmul.f32 1.442695, %v2161_v8 }
 0x824   : > { %v2103_v10 = vand.u32 2147483647, %v3615_v3  ;;  %v3621_v11 = vmul.f32 0.70710677, %v3617_v4  ;;  %vm2183_vm6 = vcmp.lt.f32.partialorder %v3615_v3, 0.0  ;;  %v2206_v3 = vsub.s32 4, %v3557_v38 }
 0x825   : > { %2910 = vrcp.f32 %v2108_v9  ;;  %v2164_v30 = vmul.f32 1.442695, %v2160_v22 }
 0x826   : > { %v2107_v12 = vmul.f32 0.3275911, %v2103_v10  ;;  %v2102_v13 = vand.u32 2147483647, %v3621_v11  ;;  %v2159_v23 = vmul.f32 %v2103_v10, %v2103_v10  ;;  %vm2182_vm7 = vcmp.lt.f32.partialorder %v3621_v11, 0.0 }
 0x828   : > { %v2111_v14 = vadd.f32 1.0, %v2107_v12  ;;  %v2106_v15 = vmul.f32 0.3275911, %v2102_v13  ;;  %v2158_v28 = vmul.f32 %v2102_v13, %v2102_v13  ;;  %v2163_v31 = vsub.f32 0.0, %v2159_v23 }
 0x82a   : > { %2912 = vrcp.f32 %v2111_v14  ;;  %v2110_v17 = vadd.f32 1.0, %v2106_v15  ;;  %v2162_v36 = vsub.f32 0.0, %v2158_v28  ;;  %v2170_v41 = vmul.f32 1.442695, %v2163_v31 }
 0x82c   : > { %2914 = vrcp.f32 %v2110_v17  ;;  %v2168_v19 = vmul.f32 1.442695, %v2162_v36  ;;  %v2092_v36 = vmul.f32 0.5, %v3605_v58 }
 0x82d   : > { %2916 = vpow2.f32 %v2166_v25 }
 0x82e   : > { %2918 = vpow2.f32 %v2164_v30 }
 0x82f   : > { %2920 = vpow2.f32 %v2170_v41 }
 0x830   : > { %v2909_v20 = vpop.eup %2908  ;;  %2922 = vpow2.f32 %v2168_v19 }
 0x831   : > { %v2121_v24 = vmul.f32 1.0614054, %v2909_v20 }
 0x832   : > { %v2911_v26 = vpop.eup %2910 }
 0x833   : > { %v2125_v27 = vadd.f32 -1.4531521, %v2121_v24  ;;  %v2120_v29 = vmul.f32 1.0614054, %v2911_v26 }
 0x835   : > { %v2129_v32 = vmul.f32 %v2909_v20, %v2125_v27  ;;  %v2124_v33 = vadd.f32 -1.4531521, %v2120_v29 }
 0x837   : > { %v2913_v34 = vpop.eup %2912  ;;  %v2133_v35 = vadd.f32 1.4214138, %v2129_v32  ;;  %v2128_v37 = vmul.f32 %v2911_v26, %v2124_v33 }
 0x838   : > { %v2123_v39 = vmul.f32 1.0614054, %v2913_v34 }
 0x839   : > { %v2137_v42 = vmul.f32 %v2909_v20, %v2133_v35  ;;  %v2915_v44 = vpop.eup %2914  ;;  %v2132_v46 = vadd.f32 1.4214138, %v2128_v37 }
 0x83a   : > { %v2127_v47 = vadd.f32 -1.4531521, %v2123_v39  ;;  %v2122_v50 = vmul.f32 1.0614054, %v2915_v44  ;;  %v2917_v7 = vpop.eup %2916 }
 0x83b   : > { %v2141_v49 = vadd.f32 -0.28449672, %v2137_v42  ;;  %v2136_v51 = vmul.f32 %v2911_v26, %v2132_v46  ;;  %v2919_v15 = vpop.eup %2918 }
 0x83c   : > { %v2131_v52 = vmul.f32 %v2913_v34, %v2127_v47  ;;  %v2126_v54 = vadd.f32 -1.4531521, %v2122_v50 }
 0x83d   : > { %v2145_v53 = vmul.f32 %v2909_v20, %v2141_v49  ;;  %v2140_v5 = vadd.f32 -0.28449672, %v2136_v51 }
 0x83e   : > { %v2135_v55 = vadd.f32 1.4214138, %v2131_v52  ;;  %v2130_v59 = vmul.f32 %v2915_v44, %v2126_v54  ;;  %v2207_v52 = vrot.slane %v3563_v40, %v2206_v3 }
 0x83f   : > { %v2149_v2 = vadd.f32 0.2548296, %v2145_v53  ;;  %v2144_v61 = vmul.f32 %v2911_v26, %v2140_v5 }
 0x840   : > { %v2139_v62 = vmul.f32 %v2913_v34, %v2135_v55  ;;  %v2134_v0 = vadd.f32 1.4214138, %v2130_v59 }
 0x841   : > { %v2153_v63 = vmul.f32 %v2909_v20, %v2149_v2  ;;  %v2148_v1 = vadd.f32 0.2548296, %v2144_v61  ;;  %v2921_v20 = vpop.eup %2920 }
 0x842   : > { %v2143_v9 = vadd.f32 -0.28449672, %v2139_v62  ;;  %v2138_v12 = vmul.f32 %v2915_v44, %v2134_v0  ;;  %v2923_v31 = vpop.eup %2922 }
 0x843   : > { %v2173_v10 = vmul.f32 %v2917_v7, %v2153_v63  ;;  %v2152_v13 = vmul.f32 %v2911_v26, %v2148_v1 }
 0x844   : > { %v2147_v14 = vmul.f32 %v2913_v34, %v2143_v9  ;;  %v2142_v17 = vadd.f32 -0.28449672, %v2138_v12 }
 0x845   : > { %v2177_v16 = vsub.f32 1.0, %v2173_v10  ;;  %v2172_v18 = vmul.f32 %v2919_v15, %v2152_v13 }
 0x846   : > { %v2151_v8 = vadd.f32 0.2548296, %v2147_v14  ;;  %v2146_v23 = vmul.f32 %v2915_v44, %v2142_v17 }
 0x847   : > { %v2185_v22 = vsub.f32 0.0, %v2177_v16  ;;  %v2176_v24 = vsub.f32 1.0, %v2172_v18 }
 0x848   : > { %v2155_v25 = vmul.f32 %v2913_v34, %v2151_v8  ;;  %v2150_v28 = vadd.f32 0.2548296, %v2146_v23 }
 0x849   : > { %v2189_v27 = vsel %vm2181_vm4, %v2185_v22, %v2177_v16  ;;  %v2184_v29 = vsub.f32 0.0, %v2176_v24 }
 0x84a   : > { %v2175_v30 = vmul.f32 %v2921_v20, %v2155_v25  ;;  %v2154_v26 = vmul.f32 %v2915_v44, %v2150_v28  ;;  %v2193_v32 = vadd.f32 1.0, %v2189_v27  ;;  %v2094_v44 = vmul.f32 0.5, %v3617_v4 }
 0x84b   : > { %v2188_v33 = vsel %vm2180_vm5, %v2184_v29, %v2176_v24 }
 0x84c   : > { %v2179_v35 = vsub.f32 1.0, %v2175_v30  ;;  %v2192_v37 = vadd.f32 1.0, %v2188_v33  ;;  %v2174_v39 = vmul.f32 %v2923_v31, %v2154_v26  ;;  %v2197_v46 = vmul.f32 %v2193_v32, %v2093_v57 }
 0x84e   : > { %v2187_v41 = vsub.f32 0.0, %v2179_v35  ;;  %v2196_v34 = vmul.f32 %v2192_v37, %v2092_v36  ;;  %v2178_v42 = vsub.f32 1.0, %v2174_v39 }
 0x850   : > { %v2191_v47 = vsel %vm2183_vm6, %v2187_v41, %v2179_v35  ;;  %v2186_v49 = vsub.f32 0.0, %v2178_v42  ;;  %2765 = vmatprep.mubr.msk.f32.mxu1 %vm373_vm0, %v2196_v34  ;;  %v2363_v34 = vsub.s32 5, %v3557_v38 }
 0x851   : > { %2766 = vmatmul.mubr.msk.f32.vlgmr.msra.gmra.mxu1 %vm373_vm0, %v2197_v46  ;;  %v2195_v60 = vadd.f32 1.0, %v2191_v47 }
 0x852   : > { %v2190_v58 = vsel %vm2182_vm7, %v2186_v49, %v2178_v42  ;;  %v2371_v42 = vsub.s32 6, %v3557_v38  ;;  %v2364_v46 = vrot.slane %v3563_v40, %v2363_v34 }
 0x853   : > { %v2194_v50 = vadd.f32 1.0, %v2190_v58  ;;  %v2199_v51 = vmul.f32 %v2195_v60, %v2095_v56 }
 0x854   : > { %v2372_v49 = vrot.slane %v3563_v40, %v2371_v42 }
 0x855   : > { %v2198_v19 = vmul.f32 %v2194_v50, %v2094_v44 }
 0x857   : > { %2768 = vmatprep.mubr.msk.f32.mxu1 %vm373_vm0, %v2198_v19 }
 0x858   : > { %2769 = vmatmul.mubr.msk.f32.gmra.mxu1 %vm373_vm0, %v2199_v51 }
 0x911   : > { %v2767_v11 = vpop.f32.mrf.mxu1 }
 0x912   : > { %v2292_v53 = vadd.f32 %v2767_v11, %v2207_v52 }
 0x913   : > { %v2286_v54 = vpop.f32.mrf.mxu1 }
 0x914   : > { %v2287_v5 = vadd.f32 %v2286_v54, %v2207_v52  ;;  %v2306_v55 = vadd.f32 %v2292_v53, %v3584_v45 }
 0x916   : > { %v2312_v4 = vsel %vm373_vm0, %v2306_v55, 0.0  ;;  %v2305_v6 = vadd.f32 %v2287_v5, %v3582_v43 }
 0x917   : > { %2313 = vadd.xlane.f32.xlu0 %v2312_v4 }
 0x918   : > { %v2770_v2 = vpop.f32.mrf.mxu1  ;;  %v2309_v59 = vsel %vm373_vm0, %v2305_v6, 0.0 }
 0x919   : > { %v2302_v61 = vadd.f32 %v2770_v2, %v2207_v52  ;;  %2310 = vadd.xlane.f32.xlu1 %v2309_v59 }
 0x91a   : > { %v2296_v62 = vpop.f32.mrf.mxu1 }
 0x91b   : > { %v2297_v63 = vadd.f32 %v2296_v62, %v2207_v52  ;;  %v2308_v0 = vadd.f32 %v2302_v61, %v3594_v21 }
 0x91d   : > { %v2318_v7 = vsel %vm373_vm0, %v2308_v0, 0.0  ;;  %v2307_v1 = vadd.f32 %v2297_v63, %v3590_v48 }
 0x91e   : > { %2319 = vadd.xlane.f32.xlu0 %v2318_v7 }
 0x91f   : > { %v2315_v45 = vsel %vm373_vm0, %v2307_v1, 0.0 }
 0x920   : > { %2316 = vadd.xlane.f32.xlu1 %v2315_v45 }
 0x9a0   : > { %v2314_v9 = vpop.xlane.xlu0 %2313 }
 0x9a1   : > { %v2322_v43 = vmul.f32 0.03125, %v2314_v9 }
 0x9a2   : > { %v2311_v10 = vpop.xlane.xlu1 %2310 }
 0x9a3   : > { %v2326_v12 = vsub.f32 %v2306_v55, %v2322_v43  ;;  %v2321_v13 = vmul.f32 0.03125, %v2311_v10 }
 0x9a5   : > { %v2325_v14 = vsub.f32 %v2305_v6, %v2321_v13  ;;  %v2330_v15 = vmul.f32 %v2326_v12, %v2326_v12 }
 0x9a7   : > { %v2320_v16 = vpop.xlane.xlu0 %2319  ;;  %v2336_v17 = vsel %vm373_vm0, %v2330_v15, 0.0  ;;  %v2329_v18 = vmul.f32 %v2325_v14, %v2325_v14 }
 0x9a8   : > { %v2324_v21 = vmul.f32 0.03125, %v2320_v16  ;;  %2337 = vadd.xlane.f32.xlu0 %v2336_v17 }
 0x9a9   : > { %v2317_v8 = vpop.xlane.xlu1 %2316  ;;  %v2333_v48 = vsel %vm373_vm0, %v2329_v18, 0.0 }
 0x9aa   : > { %v2328_v22 = vsub.f32 %v2308_v0, %v2324_v21  ;;  %v2323_v23 = vmul.f32 0.03125, %v2317_v8  ;;  %2334 = vadd.xlane.f32.xlu1 %v2333_v48 }
 0x9ac   : > { %v2327_v24 = vsub.f32 %v2307_v1, %v2323_v23  ;;  %v2332_v25 = vmul.f32 %v2328_v22, %v2328_v22 }
 0x9ae   : > { %v2342_v20 = vsel %vm373_vm0, %v2332_v25, 0.0  ;;  %v2331_v27 = vmul.f32 %v2327_v24, %v2327_v24 }
 0x9af   : > { %2343 = vadd.xlane.f32.xlu0 %v2342_v20 }
 0x9b0   : > { %v2339_v28 = vsel %vm373_vm0, %v2331_v27, 0.0 }
 0x9b1   : > { %2340 = vadd.xlane.f32.xlu1 %v2339_v28 }
 0xa31   : > { %v2338_v29 = vpop.xlane.xlu0 %2337 }
 0xa32   : > { %v2346_v30 = vmul.f32 0.03125, %v2338_v29 }
 0xa33   : > { %v2335_v26 = vpop.xlane.xlu1 %2334 }
 0xa34   : > { %v2350_v31 = vadd.f32 1e-05, %v2346_v30  ;;  %v2345_v32 = vmul.f32 0.03125, %v2335_v26 }
 0xa36   : > { %2924 = vrsqrt.f32 %v2350_v31  ;;  %v2349_v33 = vadd.f32 1e-05, %v2345_v32 }
 0xa38   : > { %2926 = vrsqrt.f32 %v2349_v33  ;;  %v2344_v35 = vpop.xlane.xlu0 %2343 }
 0xa39   : > { %v2348_v36 = vmul.f32 0.03125, %v2344_v35 }
 0xa3a   : > { %v2341_v37 = vpop.xlane.xlu1 %2340 }
 0xa3b   : > { %v2352_v39 = vadd.f32 1e-05, %v2348_v36  ;;  %v2347_v57 = vmul.f32 0.03125, %v2341_v37 }
 0xa3d   : > { %2928 = vrsqrt.f32 %v2352_v39  ;;  %v2351_v41 = vadd.f32 1e-05, %v2347_v57 }
 0xa3f   : > { %2930 = vrsqrt.f32 %v2351_v41 }
 0xa43   : > { %v2925_v47 = vpop.eup %2924 }
 0xa44   : > { %v2358_v60 = vmul.f32 %v2925_v47, %v2326_v12 }
 0xa45   : > { %v2927_v58 = vpop.eup %2926 }
 0xa46   : > { %v2366_v44 = vmul.f32 %v2364_v46, %v2358_v60  ;;  %v2357_v50 = vmul.f32 %v2927_v58, %v2325_v14 }
 0xa48   : > { %v2374_v56 = vadd.f32 %v2372_v49, %v2366_v44  ;;  %v2365_v19 = vmul.f32 %v2364_v46, %v2357_v50 }
 0xa4a   : > { %v2929_v51 = vpop.eup %2928  ;;  %v2373_v3 = vadd.f32 %v2372_v49, %v2365_v19  ;;  %2378 = vst.msk [vmem:[%s354_s13 + $0x8] sm:$0xff] %vm373_vm0, %v2374_v56 }
 0xa4b   : > { %v2360_v38 = vmul.f32 %v2929_v51, %v2328_v22 }
 0xa4c   : > { %v2931_v52 = vpop.eup %2930  ;;  %2377 = vst.msk [vmem:[%s354_s13] sm:$0xff] %vm373_vm0, %v2373_v3 }
 0xa4d   : > { %v2368_v40 = vmul.f32 %v2364_v46, %v2360_v38  ;;  %v2359_v11 = vmul.f32 %v2931_v52, %v2327_v24 }
 0xa4f   : > { %v2376_v53 = vadd.f32 %v2372_v49, %v2368_v40  ;;  %v2367_v54 = vmul.f32 %v2364_v46, %v2359_v11 }
 0xa51   : > { %v2375_v5 = vadd.f32 %v2372_v49, %v2367_v54  ;;  %2380 = vst.msk [vmem:[%s354_s13 + $0x18] sm:$0xff] %vm373_vm0, %v2376_v53 }
 0xa53   : > { %2379 = vst.msk [vmem:[%s354_s13 + $0x10] sm:$0xff] %vm373_vm0, %v2375_v5 }
 0xa54   : > { %3077 = shalt.err (!%p3074_p5)
}
 0xa55   : > { %s3078_s12 = scalar_lea.hbm %s3662_s30, 512  ;;  %s3082_s10 = scalar_lea.hbm %s3716_s7, 1024 }
 0xa56   : > { %p3079_p6 = scmp.ne.s32.totalorder %s3662_s30, %s3078_s12  ;;  %p3083_p9 = scmp.lt.s32.totalorder %s3662_s30, %s3716_s7 }
 0xa57   : > { %p3084_p2 = scmp.lt.s32.totalorder %s3082_s10, %s3078_s12 }
 0xa58   : > { %p3080_p4 = pnand %p3079_p6, %p3739_p12 }
 0xa59   : > { %p3085_p3 = por %p3084_p2, %p3083_p9 }
 0xa5a   : > { %p3081_p8 = pneg %p3080_p4 }
 0xa5c   : > { %p3086_p10 = pnand %p3085_p3, %p3081_p8 }
 0xa5e   : > { %3089 = shalt.err (!%p3086_p10)
}
 0xa5f   : > { %s3152_s11 = smov 128   ;;  %s3153_s22 = smov 8  }
 0xa60   : > { %2789 = dma.vmem_to_hbm [thread:$0]  (%p3739_p12), %s3664_s14, 512, %s3662_s30, %s2382_s1, %s3152_s11, %s3152_s11, %s3153_s22  }
 0xa61 PF: > { %s2410_s28 = sand.u32 1, %s3124_s24   ;;  %p3740_p7 = scmp.ne.s32.totalorder %s3725_s8, 0 }
 0xa62   : > { %p3741_p1 = scmp.ge.s32.totalorder %s3136_s27, 2  ;;  %s2411_s9 = scalar_lea.sflag [#allocation4], %s2410_s28 }
 0xa64   : > { %p2809_p13 = pnand %p3741_p1, %p3740_p7 }
 0xa66   : > { %p2810_p0 = pneg %p2809_p13 }
 0xa68   : > { %3119 = dma.done.wait (%p2810_p0), %s2411_s9, 512  }
 0xa69   : > { %3121 = vsyncadd (%p2810_p0), %s2411_s9, 4294966784  ;;  %p22_p11 = scmp.ge.s32.totalorder %s3294_s21, 4   ;;  %s3742_s24 = smov %s3128_s25 }
 0xa6a   : > { %s3743_s25 = smov %s3132_s26  ;;  %s3744_s26 = smov %s3310_s29 }
 0xa6b   : > { %s3745_s27 = smov %s3294_s21  ;;  %24 = sbr.rel (!%p22_p11) target bundleno = 9 (0x9), region = 109 }
 0xa70   :  { %2416 = vsyncpa [#allocation3], 1 }
 0xa71   :  { %2418 = vsyncpa [#allocation3 + $0x1], 1 }
 0xa72   :  { %2419 = vsyncpa [#allocation6], 1 }
 0xa73   :  { %2420 = vsyncpa [#allocation9], 1 }
 0xa74   :  { %2421 = vsyncpa [#allocation4], 1 }
 0xa75   :  { %2423 = vsyncpa [#allocation4 + $0x1], 1 }

</bundles_post_ra>
